<compile_context>
chip_gen: v7x
topology: tpu7x:2x2x1
jax: 0.10.0
libtpu: 0.0.40
codegen_flags: <defaults>
</compile_context>

<pallas_src>
import jax
import jax.numpy as jnp
from jax import lax
from jax.experimental import pallas as pl
from jax.experimental.pallas import tpu as pltpu


def bottleneck_kernel(x_ref, w1_ref, b1_ref, w2_ref, b2_ref, w3_ref, b3_ref,
                      out_ref):
    _, H, W, Cin = x_ref.shape
    P = w1_ref.shape[1]
    Cout = w3_ref.shape[1]

    # --- conv1 (1x1) + bn1 (scale folded into w1) + relu --------------------
    x_bf = x_ref[...].reshape(H * W, Cin).astype(jnp.bfloat16)
    h1 = jnp.dot(x_bf, w1_ref[...], preferred_element_type=jnp.float32)
    h1 = jnp.maximum(h1 + b1_ref[...], 0.0)

    # --- conv2 (3x3, stride=1, pad=1) + bn2 + relu --------------------------
    # im2col: build (H*W, 9*P) patch matrix once, single MXU matmul (K = 9*P).
    h1 = h1.astype(jnp.bfloat16).reshape(H, W, P)
    h1p = jnp.pad(h1, ((1, 1), (1, 1), (0, 0)))
    patches = jnp.concatenate(
        [h1p[dy:dy + H, dx:dx + W, :] for dy in range(3) for dx in range(3)],
        axis=-1).reshape(H * W, 9 * P)
    h2 = jnp.dot(patches, w2_ref[...], preferred_element_type=jnp.float32)
    h2 = jnp.maximum(h2 + b2_ref[...], 0.0)

    # --- conv3 (1x1) + bn3 --------------------------------------------------
    h3 = jnp.dot(h2.astype(jnp.bfloat16), w3_ref[...],
                 preferred_element_type=jnp.float32)
    h3 = h3 + b3_ref[...]

    # --- residual add + relu (re-read x from VMEM; keep math in f32) --------
    res = x_ref[...].reshape(H * W, Cout).astype(jnp.float32)
    out = jnp.maximum(h3 + res, 0.0)
    out_ref[...] = out.reshape(1, H, W, Cout).astype(out_ref.dtype)


def _round_up(c, m=128):
    return (c + m - 1) // m * m


def fold_bn(gamma, beta, mean, var, eps=1e-5):
    scale = gamma / jnp.sqrt(var + eps)
    bias = beta - mean * scale
    return scale, bias


def bottleneck_forward(x_nchw, params):
    """x_nchw: (N, Cin, H, W) float32. Returns (N, Cout, H, W)."""
    (c1w, bn1, c2w, bn2, c3w, bn3) = params
    N, Cin, H, W = x_nchw.shape
    P = c1w.shape[0]
    Cout = c3w.shape[0]
    assert Cin == Cout, \
        "stride=1 / downsample=None requires inplanes == planes*expansion"

    # Fold BN scale into conv weights; keep only per-channel bias for the kernel.
    s1, b1 = fold_bn(*bn1)
    s2, b2 = fold_bn(*bn2)
    s3, b3 = fold_bn(*bn3)

    w1 = jnp.transpose(c1w[:, :, 0, 0], (1, 0)) * s1[None, :]            # (Cin, P)
    w2 = jnp.transpose(c2w, (2, 3, 1, 0)) * s2[None, None, None, :]      # (3,3,P,P)
    w3 = jnp.transpose(c3w[:, :, 0, 0], (1, 0)) * s3[None, :]            # (P, Cout)

    # Pad channel dims to multiples of 128 (lane-dense MXU tiles / unmasked stores).
    Cin_p, P_p, Cout_p = _round_up(Cin), _round_up(P), _round_up(Cout)

    w1p = jnp.zeros((Cin_p, P_p), jnp.float32).at[:Cin, :P].set(w1)
    w1p = w1p.astype(jnp.bfloat16)
    w2p = jnp.zeros((3, 3, P_p, P_p), jnp.float32).at[:, :, :P, :P].set(w2)
    w2p = w2p.reshape(9 * P_p, P_p).astype(jnp.bfloat16)     # matches patch order
    w3p = jnp.zeros((P_p, Cout_p), jnp.float32).at[:P, :Cout].set(w3)
    w3p = w3p.astype(jnp.bfloat16)
    b1p = jnp.zeros((1, P_p), jnp.float32).at[0, :P].set(b1)
    b2p = jnp.zeros((1, P_p), jnp.float32).at[0, :P].set(b2)
    b3p = jnp.zeros((1, Cout_p), jnp.float32).at[0, :Cout].set(b3)

    # NCHW -> NHWC + channel padding.
    # TODO(synk): in a full NHWC ResNet these transposes / pads happen once
    #             outside the block chain instead of per Bottleneck.
    x = jnp.transpose(x_nchw, (0, 2, 3, 1))
    x = jnp.pad(x, ((0, 0), (0, 0), (0, 0), (0, Cin_p - Cin)))

    flops = 2 * N * H * W * (Cin_p * P_p + 9 * P_p * P_p + P_p * Cout_p)
    bytes_accessed = (x.size * 4 + N * H * W * Cout_p * 4
                      + (w1p.size + w2p.size + w3p.size) * 2
                      + (b1p.size + b2p.size + b3p.size) * 4)

    grid_spec = pltpu.PrefetchScalarGridSpec(
        num_scalar_prefetch=0,
        grid=(N,),
        in_specs=[
            pl.BlockSpec((1, H, W, Cin_p), lambda n: (n, 0, 0, 0)),   # x
            pl.BlockSpec((Cin_p, P_p), lambda n: (0, 0)),             # w1 (resident)
            pl.BlockSpec((1, P_p), lambda n: (0, 0)),                 # b1
            pl.BlockSpec((9 * P_p, P_p), lambda n: (0, 0)),           # w2 (im2col)
            pl.BlockSpec((1, P_p), lambda n: (0, 0)),                 # b2
            pl.BlockSpec((P_p, Cout_p), lambda n: (0, 0)),            # w3
            pl.BlockSpec((1, Cout_p), lambda n: (0, 0)),              # b3
        ],
        out_specs=pl.BlockSpec((1, H, W, Cout_p), lambda n: (n, 0, 0, 0)),
    )

    out = pl.pallas_call(
        bottleneck_kernel,
        out_shape=jax.ShapeDtypeStruct((N, H, W, Cout_p), x_nchw.dtype),
        grid_spec=grid_spec,
        compiler_params=pltpu.CompilerParams(
            dimension_semantics=("parallel",),        # shard batch across TCs (v7x)
            vmem_limit_bytes=32 * 1024 * 1024,        # fits v7x's tighter budget
        ),
        cost_estimate=pl.CostEstimate(
            flops=flops, transcendentals=0, bytes_accessed=bytes_accessed),
    )(x, w1p, b1p, w2p, b2p, w3p, b3p)

    out = out[..., :Cout]                              # drop channel padding
    return jnp.transpose(out, (0, 3, 1, 2))            # back to NCHW


def reference_forward(x, params):
    """Plain-JAX (lax.conv) f32 reference in NCHW for correctness checking."""
    (c1w, bn1, c2w, bn2, c3w, bn3) = params
    dn = ('NCHW', 'OIHW', 'NCHW')

    def bn(y, p):
        g, b, m, v = p
        s = g / jnp.sqrt(v + 1e-5)
        return y * s[None, :, None, None] + (b - m * s)[None, :, None, None]

    out = lax.conv_general_dilated(x, c1w, (1, 1), 'VALID', dimension_numbers=dn)
    out = jnp.maximum(bn(out, bn1), 0.0)
    out = lax.conv_general_dilated(out, c2w, (1, 1), ((1, 1), (1, 1)),
                                   dimension_numbers=dn)
    out = jnp.maximum(bn(out, bn2), 0.0)
    out = lax.conv_general_dilated(out, c3w, (1, 1), 'VALID', dimension_numbers=dn)
    out = bn(out, bn3)
    return jnp.maximum(out + x, 0.0)


def init_params(key, inplanes, planes, expansion=4):
    ks = jax.random.split(key, 6)
    c1w = jax.random.normal(ks[0], (planes, inplanes, 1, 1), jnp.float32) * 0.1
    c2w = jax.random.normal(ks[1], (planes, planes, 3, 3), jnp.float32) * 0.1
    c3w = jax.random.normal(ks[2], (planes * expansion, planes, 1, 1),
                            jnp.float32) * 0.1

    def bn_params(k, c):
        k1, k2, k3, k4 = jax.random.split(k, 4)
        gamma = 1.0 + 0.1 * jax.random.normal(k1, (c,), jnp.float32)
        beta = 0.1 * jax.random.normal(k2, (c,), jnp.float32)
        mean = 0.1 * jax.random.normal(k3, (c,), jnp.float32)
        var = 1.0 + 0.1 * jax.random.uniform(k4, (c,), jnp.float32)
        return (gamma, beta, mean, var)

    bn1 = bn_params(ks[3], planes)
    bn2 = bn_params(ks[4], planes)
    bn3 = bn_params(ks[5], planes * expansion)
    return (c1w, bn1, c2w, bn2, c3w, bn3)


if __name__ == "__main__":
    key = jax.random.PRNGKey(0)
    k_x, k_p = jax.random.split(key)

    inplanes, planes, expansion = 16, 4, 4   # inplanes == planes * expansion
    N, H, W = 2, 16, 16

    x = jax.random.normal(k_x, (N, inplanes, H, W), jnp.float32)
    params = init_params(k_p, inplanes, planes, expansion)

    out = bottleneck_forward(x, params)
    out = jax.block_until_ready(out)

    ref = reference_forward(x, params)
    assert out.shape == (N, planes * expansion, H, W)
    # bf16 MXU operands (f32 accumulation) -> compare at bf16-level tolerance.
    max_err = jnp.max(jnp.abs(out - ref))
    assert jnp.allclose(out, ref, atol=5e-2, rtol=5e-2), \
        f"max abs err {max_err}"

    print("KERNEL_OK")
</pallas_src>

<mosaic_0001>
module attributes {stable_mosaic.version = 11 : i64} {
  func.func @bottleneck_kernel(%arg0: i32, %arg1: memref<1x16x16x128xf32, #tpu.memory_space<vmem>>, %arg2: memref<128x128xbf16, #tpu.memory_space<vmem>>, %arg3: memref<1x128xf32, #tpu.memory_space<vmem>>, %arg4: memref<1152x128xbf16, #tpu.memory_space<vmem>>, %arg5: memref<1x128xf32, #tpu.memory_space<vmem>>, %arg6: memref<128x128xbf16, #tpu.memory_space<vmem>>, %arg7: memref<1x128xf32, #tpu.memory_space<vmem>>, %arg8: memref<1x16x16x128xf32, #tpu.memory_space<vmem>>) attributes {dimension_semantics = [#tpu.dimension_semantics<parallel>], iteration_bounds = array<i64: 2>, scalar_prefetch = 0 : i64, scratch_operands = 0 : i64, tpu.core_type = #tpu.core_type<tc>, window_params = [{transform_indices = @transform_0, window_bounds = array<i64: 1, 16, 16, 128>}, {pipeline_mode = #tpu.pipeline_mode<synchronous>, transform_indices = @transform_1, window_bounds = array<i64: 128, 128>}, {pipeline_mode = #tpu.pipeline_mode<synchronous>, transform_indices = @transform_2, window_bounds = array<i64: 1, 128>}, {pipeline_mode = #tpu.pipeline_mode<synchronous>, transform_indices = @transform_3, window_bounds = array<i64: 1152, 128>}, {pipeline_mode = #tpu.pipeline_mode<synchronous>, transform_indices = @transform_4, window_bounds = array<i64: 1, 128>}, {pipeline_mode = #tpu.pipeline_mode<synchronous>, transform_indices = @transform_5, window_bounds = array<i64: 128, 128>}, {pipeline_mode = #tpu.pipeline_mode<synchronous>, transform_indices = @transform_6, window_bounds = array<i64: 1, 128>}, {transform_indices = @transform_7, window_bounds = array<i64: 1, 16, 16, 128>}]} {
    %c0 = arith.constant 0 : index
    %c0_0 = arith.constant 0 : index
    %c0_1 = arith.constant 0 : index
    %c0_2 = arith.constant 0 : index
    %0 = vector.load %arg1[%c0, %c0_0, %c0_1, %c0_2] : memref<1x16x16x128xf32, #tpu.memory_space<vmem>>, vector<1x16x16x128xf32>
    %1 = vector.shape_cast %0 : vector<1x16x16x128xf32> to vector<256x128xf32>
    %2 = arith.truncf %1 : vector<256x128xf32> to vector<256x128xbf16>
    %c0_3 = arith.constant 0 : index
    %c0_4 = arith.constant 0 : index
    %3 = vector.load %arg2[%c0_3, %c0_4] : memref<128x128xbf16, #tpu.memory_space<vmem>>, vector<128x128xbf16>
    %cst = arith.constant dense<0.000000e+00> : vector<256x128xf32>
    %4 = tpu.matmul %2, %3, %cst {dimension_numbers = #tpu.dot_dimension_numbers<[1], [0], [0], [1], [0, 0, 1, 1], [], []>} : vector<256x128xbf16>, vector<128x128xbf16>, vector<256x128xf32> -> vector<256x128xf32>
    %c0_5 = arith.constant 0 : index
    %c0_6 = arith.constant 0 : index
    %5 = vector.load %arg3[%c0_5, %c0_6] : memref<1x128xf32, #tpu.memory_space<vmem>>, vector<1x128xf32>
    %6 = vector.broadcast %5 : vector<1x128xf32> to vector<256x128xf32>
    %7 = arith.addf %4, %6 : vector<256x128xf32>
    %cst_7 = arith.constant 0.000000e+00 : f32
    %8 = vector.broadcast %cst_7 : f32 to vector<256x128xf32>
    %9 = arith.maximumf %7, %8 : vector<256x128xf32>
    %10 = arith.truncf %9 : vector<256x128xf32> to vector<256x128xbf16>
    %11 = vector.shape_cast %10 : vector<256x128xbf16> to vector<16x16x128xbf16>
    %c0_i32 = arith.constant 0 : i32
    %12 = arith.sitofp %c0_i32 : i32 to bf16
    %13 = vector.broadcast %12 : bf16 to vector<1x16x128xbf16>
    %14 = tpu.concatenate %13, %11 in 0 : vector<1x16x128xbf16>, vector<16x16x128xbf16> -> vector<17x16x128xbf16>
    %15 = vector.broadcast %12 : bf16 to vector<1x16x128xbf16>
    %16 = tpu.concatenate %14, %15 in 0 : vector<17x16x128xbf16>, vector<1x16x128xbf16> -> vector<18x16x128xbf16>
    %17 = vector.broadcast %12 : bf16 to vector<18x1x128xbf16>
    %18 = tpu.concatenate %17, %16 in 1 : vector<18x1x128xbf16>, vector<18x16x128xbf16> -> vector<18x17x128xbf16>
    %19 = vector.broadcast %12 : bf16 to vector<18x1x128xbf16>
    %20 = tpu.concatenate %18, %19 in 1 : vector<18x17x128xbf16>, vector<18x1x128xbf16> -> vector<18x18x128xbf16>
    %21 = vector.extract_strided_slice %20 {offsets = [0, 0, 0], sizes = [16, 16, 128], strides = [1, 1, 1]} : vector<18x18x128xbf16> to vector<16x16x128xbf16>
    %22 = vector.extract_strided_slice %20 {offsets = [0, 1, 0], sizes = [16, 16, 128], strides = [1, 1, 1]} : vector<18x18x128xbf16> to vector<16x16x128xbf16>
    %23 = vector.extract_strided_slice %20 {offsets = [0, 2, 0], sizes = [16, 16, 128], strides = [1, 1, 1]} : vector<18x18x128xbf16> to vector<16x16x128xbf16>
    %24 = vector.extract_strided_slice %20 {offsets = [1, 0, 0], sizes = [16, 16, 128], strides = [1, 1, 1]} : vector<18x18x128xbf16> to vector<16x16x128xbf16>
    %25 = vector.extract_strided_slice %20 {offsets = [1, 1, 0], sizes = [16, 16, 128], strides = [1, 1, 1]} : vector<18x18x128xbf16> to vector<16x16x128xbf16>
    %26 = vector.extract_strided_slice %20 {offsets = [1, 2, 0], sizes = [16, 16, 128], strides = [1, 1, 1]} : vector<18x18x128xbf16> to vector<16x16x128xbf16>
    %27 = vector.extract_strided_slice %20 {offsets = [2, 0, 0], sizes = [16, 16, 128], strides = [1, 1, 1]} : vector<18x18x128xbf16> to vector<16x16x128xbf16>
    %28 = vector.extract_strided_slice %20 {offsets = [2, 1, 0], sizes = [16, 16, 128], strides = [1, 1, 1]} : vector<18x18x128xbf16> to vector<16x16x128xbf16>
    %29 = vector.extract_strided_slice %20 {offsets = [2, 2, 0], sizes = [16, 16, 128], strides = [1, 1, 1]} : vector<18x18x128xbf16> to vector<16x16x128xbf16>
    %30 = tpu.concatenate %21, %22, %23, %24, %25, %26, %27, %28, %29 in 2 : vector<16x16x128xbf16>, vector<16x16x128xbf16>, vector<16x16x128xbf16>, vector<16x16x128xbf16>, vector<16x16x128xbf16>, vector<16x16x128xbf16>, vector<16x16x128xbf16>, vector<16x16x128xbf16>, vector<16x16x128xbf16> -> vector<16x16x1152xbf16>
    %31 = vector.shape_cast %30 : vector<16x16x1152xbf16> to vector<256x1152xbf16>
    %c0_8 = arith.constant 0 : index
    %c0_9 = arith.constant 0 : index
    %32 = vector.load %arg4[%c0_8, %c0_9] : memref<1152x128xbf16, #tpu.memory_space<vmem>>, vector<1152x128xbf16>
    %cst_10 = arith.constant dense<0.000000e+00> : vector<256x128xf32>
    %33 = tpu.matmul %31, %32, %cst_10 {dimension_numbers = #tpu.dot_dimension_numbers<[1], [0], [0], [1], [0, 0, 1, 1], [], []>} : vector<256x1152xbf16>, vector<1152x128xbf16>, vector<256x128xf32> -> vector<256x128xf32>
    %c0_11 = arith.constant 0 : index
    %c0_12 = arith.constant 0 : index
    %34 = vector.load %arg5[%c0_11, %c0_12] : memref<1x128xf32, #tpu.memory_space<vmem>>, vector<1x128xf32>
    %35 = vector.broadcast %34 : vector<1x128xf32> to vector<256x128xf32>
    %36 = arith.addf %33, %35 : vector<256x128xf32>
    %cst_13 = arith.constant 0.000000e+00 : f32
    %37 = vector.broadcast %cst_13 : f32 to vector<256x128xf32>
    %38 = arith.maximumf %36, %37 : vector<256x128xf32>
    %39 = arith.truncf %38 : vector<256x128xf32> to vector<256x128xbf16>
    %c0_14 = arith.constant 0 : index
    %c0_15 = arith.constant 0 : index
    %40 = vector.load %arg6[%c0_14, %c0_15] : memref<128x128xbf16, #tpu.memory_space<vmem>>, vector<128x128xbf16>
    %cst_16 = arith.constant dense<0.000000e+00> : vector<256x128xf32>
    %41 = tpu.matmul %39, %40, %cst_16 {dimension_numbers = #tpu.dot_dimension_numbers<[1], [0], [0], [1], [0, 0, 1, 1], [], []>} : vector<256x128xbf16>, vector<128x128xbf16>, vector<256x128xf32> -> vector<256x128xf32>
    %c0_17 = arith.constant 0 : index
    %c0_18 = arith.constant 0 : index
    %42 = vector.load %arg7[%c0_17, %c0_18] : memref<1x128xf32, #tpu.memory_space<vmem>>, vector<1x128xf32>
    %43 = vector.broadcast %42 : vector<1x128xf32> to vector<256x128xf32>
    %44 = arith.addf %41, %43 : vector<256x128xf32>
    %c0_19 = arith.constant 0 : index
    %c0_20 = arith.constant 0 : index
    %c0_21 = arith.constant 0 : index
    %c0_22 = arith.constant 0 : index
    %45 = vector.load %arg1[%c0_19, %c0_20, %c0_21, %c0_22] : memref<1x16x16x128xf32, #tpu.memory_space<vmem>>, vector<1x16x16x128xf32>
    %46 = vector.shape_cast %45 : vector<1x16x16x128xf32> to vector<256x128xf32>
    %47 = arith.addf %44, %46 : vector<256x128xf32>
    %cst_23 = arith.constant 0.000000e+00 : f32
    %48 = vector.broadcast %cst_23 : f32 to vector<256x128xf32>
    %49 = arith.maximumf %47, %48 : vector<256x128xf32>
    %50 = vector.shape_cast %49 : vector<256x128xf32> to vector<1x16x16x128xf32>
    %c0_24 = arith.constant 0 : index
    %c0_25 = arith.constant 0 : index
    %c0_26 = arith.constant 0 : index
    %c0_27 = arith.constant 0 : index
    %51 = vector.load %arg8[%c0_24, %c0_25, %c0_26, %c0_27] : memref<1x16x16x128xf32, #tpu.memory_space<vmem>>, vector<1x16x16x128xf32>
    tpu.vector_store %arg8[%c0_24, %c0_25, %c0_26, %c0_27], %50 {strides = array<i32>} : memref<1x16x16x128xf32, #tpu.memory_space<vmem>>, vector<1x16x16x128xf32>,
    return
  }
  func.func @transform_0(%arg0: i32) -> (i32, i32, i32, i32) {
    %c0_i32 = arith.constant 0 : i32
    %c0_i32_0 = arith.constant 0 : i32
    %c0_i32_1 = arith.constant 0 : i32
    %c0_i32_2 = arith.constant 0 : i32
    return %arg0, %c0_i32, %c0_i32_0, %c0_i32_1 : i32, i32, i32, i32
  }
  func.func @transform_1(%arg0: i32) -> (i32, i32) {
    %c0_i32 = arith.constant 0 : i32
    %c0_i32_0 = arith.constant 0 : i32
    %c0_i32_1 = arith.constant 0 : i32
    return %c0_i32, %c0_i32_0 : i32, i32
  }
  func.func @transform_2(%arg0: i32) -> (i32, i32) {
    %c0_i32 = arith.constant 0 : i32
    %c0_i32_0 = arith.constant 0 : i32
    %c0_i32_1 = arith.constant 0 : i32
    return %c0_i32, %c0_i32_0 : i32, i32
  }
  func.func @transform_3(%arg0: i32) -> (i32, i32) {
    %c0_i32 = arith.constant 0 : i32
    %c0_i32_0 = arith.constant 0 : i32
    %c0_i32_1 = arith.constant 0 : i32
    return %c0_i32, %c0_i32_0 : i32, i32
  }
  func.func @transform_4(%arg0: i32) -> (i32, i32) {
    %c0_i32 = arith.constant 0 : i32
    %c0_i32_0 = arith.constant 0 : i32
    %c0_i32_1 = arith.constant 0 : i32
    return %c0_i32, %c0_i32_0 : i32, i32
  }
  func.func @transform_5(%arg0: i32) -> (i32, i32) {
    %c0_i32 = arith.constant 0 : i32
    %c0_i32_0 = arith.constant 0 : i32
    %c0_i32_1 = arith.constant 0 : i32
    return %c0_i32, %c0_i32_0 : i32, i32
  }
  func.func @transform_6(%arg0: i32) -> (i32, i32) {
    %c0_i32 = arith.constant 0 : i32
    %c0_i32_0 = arith.constant 0 : i32
    %c0_i32_1 = arith.constant 0 : i32
    return %c0_i32, %c0_i32_0 : i32, i32
  }
  func.func @transform_7(%arg0: i32) -> (i32, i32, i32, i32) {
    %c0_i32 = arith.constant 0 : i32
    %c0_i32_0 = arith.constant 0 : i32
    %c0_i32_1 = arith.constant 0 : i32
    %c0_i32_2 = arith.constant 0 : i32
    return %arg0, %c0_i32, %c0_i32_0, %c0_i32_1 : i32, i32, i32, i32
  }
}

</mosaic_0001>

<bundles_post_ra>
// kernel: tpu_custom_call.1
= control target key start
LH: loop header
LB: loop body
LE: loop exit
PB: predicated region body
PF: predicated region fallthrough
CT: control target
= control target key end

     0   :  { %12 = vsyncpa [#allocation3], 0  ;;  %s5494_s0 = inlined_call_operand.hbm [shape: f32[2,16,16,128], index: 0, kind: input, shape index: {}]   ;;  %s5495_s1 = inlined_call_operand.hbm [shape: bf16[128,128], index: 1, kind: input, shape index: {}]   ;;  %s5496_s2 = inlined_call_operand.vmem [shape: f32[1,128], index: 2, kind: input, shape index: {}]   ;;  %s5497_s3 = inlined_call_operand.hbm [shape: bf16[1152,128], index: 3, kind: input, shape index: {}]   ;;  %s5498_s4 = inlined_call_operand.vmem [shape: f32[1,128], index: 4, kind: input, shape index: {}]   ;;  %s5499_s5 = inlined_call_operand.hbm [shape: bf16[128,128], index: 5, kind: input, shape index: {}]   ;;  %s5500_s6 = inlined_call_operand.vmem [shape: f32[1,128], index: 6, kind: input, shape index: {}]   ;;  %s5501_s7 = inlined_call_operand.hbm [shape: f32[2,16,16,128], index: 7, kind: output, shape index: {}]  }
   0x1   :  { %14 = vsyncpa [#allocation3 + $0x1], 0 }
   0x2   :  { %15 = vsyncpa [#allocation6], 0 }
   0x3   :  { %16 = vsyncpa [#allocation9], 0 }
   0x4   :  { %17 = vsyncpa [#allocation4], 0 }
   0x5   :  { %19 = vsyncpa [#allocation4 + $0x1], 0  ;;  %s4304_s24 = smov 0   ;;  %s4306_s25 = smov 0  }
   0x6   :  { %s4308_s26 = smov 0   ;;  %s4310_s27 = smov 0  }
   0x7 LB: > { %s4325_s28 = sadd.s32 4294967295, %s4250_s27   ;;  %s3065_s29 = sadd.s32 4294967294, %s4250_s27   ;;  %s4250_s27 = sphi %s4310_s27, %s5532_s27   ;;  %s4246_s26 = sphi %s4308_s26, %s5531_s26   ;;  %s4242_s25 = sphi %s4306_s25, %s5530_s25   ;;  %s4238_s24 = sphi %s4304_s24, %s5529_s24  }
   0x8   : > { %p45_p0 = scmp.ne.s32.totalorder %s4242_s25, %s4238_s24  ;;  %p5502_p1 = scmp.eq.s32.totalorder %s4325_s28, 0 }
   0x9   : > { %p201_p3 = scmp.eq.s32.totalorder %s3065_s29, 1  ;;  %p3066_p5 = scmp.ge.s32.totalorder %s4250_s27, 1 }
   0xa   : > { %p4334_p4 = por %p5502_p1, %p45_p0  ;;  %p208_p7 = scmp.lt.s32.totalorder %s4250_s27, 3 }
   0xb   : > { %p4339_p6 = por %p201_p3, %p45_p0  ;;  %s4252_s10 = smov [#allocation5]  }
   0xc   : > { %s5507_s30 = scalar_select %p4334_p4, 1, 0 }
   0xd   : > { %s5508_s8 = scalar_select %p4339_p6, 1, 0 }
   0xe   : > { %p4344_p8 = pnand %p3066_p5, %p208_p7  ;;  %s220_s11 = sshll.u32 %s4252_s10, 4  ;;  %s4348_s11 = int_to_ptr.vmem [resolvable:$true] %s220_s11 }
   0xf   : > { %5509 = sst [smem:[#allocation15_spill]] %s5508_s8  ;;  %s4253_s13 = smov [#allocation7]  }
  0x10   : > { %s5510_s9 = scalar_select %p4344_p8, 1, 0 }
  0x11   : > { %p3874_p9 = pneg %p4344_p8  ;;  %s236_s14 = sshll.u32 %s4253_s13, 4  ;;  %s4359_s14 = int_to_ptr.vmem [resolvable:$true] %s236_s14 }
  0x12   : > { %s4254_s15 = smov [#allocation8]   ;;  %s4062_s19 = scalar_lea.hbm %s5495_s1, 1024 }
  0x13   : > { %p4355_p11 = pnand %p3874_p9, %p5502_p1  ;;  %s4361_s16 = sshll.u32 %s4254_s15, 4  ;;  %s253_s16 = int_to_ptr.vmem [resolvable:$true] %s4361_s16 }
  0x14   : > { %p4063_p12 = scmp.ne.s32.totalorder %s5495_s1, %s4062_s19  ;;  %p4069_p5 = scmp.lt.u32.totalorder %s4062_s19, %s5495_s1 }
  0x15   : > { %p4371_p13 = pneg %p4355_p11 }
  0x17   : > { %p4065_p0 = pnand %p4371_p13, %p4063_p12 }
  0x19   : > { %p4066_p3 = pneg %p4065_p0 }
  0x1b   : > { %p4071_p7 = pnand %p4069_p5, %p4066_p3 }
  0x1d   : > { %4074 = shalt.err (!%p4071_p7)
}
  0x1e   : > { %s4075_s10 = scalar_lea.vmem %s4348_s11, 1024  ;;  %p4083_p2 = scmp.lt.s32.totalorder %s4348_s11, %s4348_s11 }
  0x1f   : > { %p4076_p9 = scmp.ne.s32.totalorder %s4348_s11, %s4075_s10  ;;  %p4084_p6 = scmp.lt.s32.totalorder %s4075_s10, %s4075_s10 }
  0x21   : > { %p4078_p10 = pnand %p4076_p9, %p4371_p13  ;;  %p4085_p12 = por %p4084_p6, %p4083_p2 }
  0x23   : > { %p4079_p1 = pneg %p4078_p10 }
  0x25   : > { %p4086_p0 = pnand %p4085_p12, %p4079_p1 }
  0x27   : > { %4089 = shalt.err (!%p4086_p0)
}
  0x28   : > { %s4255_s13 = smov 64   ;;  %s4256_s15 = smov 4  }
  0x29   : > { %3877 = dma.hbm_to_vmem [thread:$0]  (!%p4355_p11), %s5495_s1, 1024, %s4348_s11, [#allocation6], %s4255_s13, %s4255_s13, %s4256_s15  }
  0x2a   : > { %s4090_s21 = scalar_lea.hbm %s5497_s3, 9216 }
  0x2b   : > { %p4091_p1 = scmp.ne.s32.totalorder %s5497_s3, %s4090_s21  ;;  %p4097_p10 = scmp.lt.u32.totalorder %s4090_s21, %s5497_s3 }
  0x2d   : > { %p4093_p2 = pnand %p4091_p1, %p4371_p13 }
  0x2f   : > { %p4094_p6 = pneg %p4093_p2 }
  0x31   : > { %p4099_p3 = pnand %p4097_p10, %p4094_p6 }
  0x33   : > { %4102 = shalt.err (!%p4099_p3)
}
  0x34   : > { %s4103_s11 = scalar_lea.vmem %s4359_s14, 9216  ;;  %p4111_p12 = scmp.lt.s32.totalorder %s4359_s14, %s4359_s14 }
  0x35   : > { %p4104_p5 = scmp.ne.s32.totalorder %s4359_s14, %s4103_s11  ;;  %p4112_p0 = scmp.lt.s32.totalorder %s4103_s11, %s4103_s11 }
  0x37   : > { %p4106_p7 = pnand %p4104_p5, %p4371_p13  ;;  %p4113_p1 = por %p4112_p0, %p4111_p12 }
  0x39   : > { %p4107_p9 = pneg %p4106_p7 }
  0x3b   : > { %p4114_p2 = pnand %p4113_p1, %p4107_p9 }
  0x3d   : > { %4117 = shalt.err (!%p4114_p2)
}
  0x3e   : > { %3880 = dma.hbm_to_vmem [thread:$0]  (!%p4355_p11), %s5497_s3, 9216, %s4359_s14, [#allocation6], %s4255_s13, %s4255_s13, %s4256_s15  }
  0x3f   : > { %s4118_s20 = scalar_lea.hbm %s5499_s5, 1024 }
  0x40   : > { %p4119_p6 = scmp.ne.s32.totalorder %s5499_s5, %s4118_s20  ;;  %p4125_p5 = scmp.lt.u32.totalorder %s4118_s20, %s5499_s5 }
  0x42   : > { %p4121_p10 = pnand %p4119_p6, %p4371_p13 }
  0x44   : > { %p4122_p3 = pneg %p4121_p10 }
  0x46   : > { %p4127_p7 = pnand %p4125_p5, %p4122_p3 }
  0x48   : > { %4130 = shalt.err (!%p4127_p7)
}
  0x49   : > { %s4131_s11 = scalar_lea.vmem %s253_s16, 1024  ;;  %p4139_p1 = scmp.lt.s32.totalorder %s253_s16, %s253_s16 }
  0x4a   : > { %p4132_p9 = scmp.ne.s32.totalorder %s253_s16, %s4131_s11  ;;  %p4140_p2 = scmp.lt.s32.totalorder %s4131_s11, %s4131_s11 }
  0x4c   : > { %p4134_p12 = pnand %p4132_p9, %p4371_p13  ;;  %p4141_p4 = por %p4140_p2, %p4139_p1 }
  0x4e   : > { %p4135_p0 = pneg %p4134_p12 }
  0x50   : > { %p4142_p8 = pnand %p4141_p4, %p4135_p0 }
  0x52   : > { %4145 = shalt.err (!%p4142_p8)
}
  0x53   : > { %3883 = dma.hbm_to_vmem [thread:$0]  (!%p4355_p11), %s5499_s5, 1024, %s253_s16, [#allocation9], %s4255_s13, %s4255_s13, %s4256_s15  }
  0x54   : > { %s4444_s22 = sadd.s32 1, %s4250_s27   ;;  %s32_s17 = sadd.s32 1, %s4246_s26 }
  0x55   : > { %s29_s12 = ssub.s32 %s4250_s27, %s4444_s22  ;;  %p39_p8 = scmp.ne.s32.totalorder %s4246_s26, %s4242_s25 }
  0x56   : > { %p30_p4 = scmp.eq.s32.totalorder %s29_s12, 0  ;;  %p40_p13 = scmp.eq.s32.totalorder %s4250_s27, 0 }
  0x57   : > { %p3895_p6 = scmp.lt.s32.totalorder %s4250_s27, 2  ;;  %p5513_p3 = scmp.eq.s32.totalorder %s4325_s28, 1 }
  0x58   : > { %s4454_s18 = scalar_select %p30_p4, %s4246_s26, %s32_s17  }
  0x59   : > { %p41_p10 = por %p40_p13, %p39_p8  ;;  %p4458_p5 = por %p5513_p3, %p39_p8 }
  0x5a   : > { %s269_s20 = sand.u32 1, %s4246_s26   ;;  %s3176_s21 = sshll.u32 %s4250_s27, 12 }
  0x5b   : > { %s3071_s16 = sshll.u32 %s269_s20, 8  ;;  %s4467_s23 = scalar_lea.hbm %s5494_s0, %s3176_s21 }
  0x5c   : > { %s273_s29 = scalar_lea.vmem [#allocation2], %s3071_s16  ;;  %p4469_p11 = pnand %p3895_p6, %p41_p10 }
  0x5d   : > { %s280_s10 = sshll.u32 %s273_s29, 4  ;;  %s4475_s14 = scalar_lea.sflag [#allocation3], %s269_s20  ;;  %s4473_s10 = int_to_ptr.vmem [resolvable:$true] %s280_s10 }
  0x5e   : > { %s4146_s8 = scalar_lea.hbm %s4467_s23, 4096  ;;  %p4148_p9 = pneg %p4469_p11 }
  0x5f   : > { %p4147_p7 = scmp.ne.s32.totalorder %s4467_s23, %s4146_s8  ;;  %s4151_s21 = scalar_lea.hbm %s5494_s0, 8192 }
  0x60   : > { %p4152_p1 = scmp.lt.u32.totalorder %s4467_s23, %s5494_s0  ;;  %p4153_p2 = scmp.lt.u32.totalorder %s4151_s21, %s4146_s8 }
  0x61   : > { %p4149_p12 = pnand %p4148_p9, %p4147_p7  ;;  %p4155_p8 = scmp.lt.u32.totalorder %s4146_s8, %s4467_s23 }
  0x62   : > { %p4154_p4 = por %p4153_p2, %p4152_p1 }
  0x63   : > { %p4150_p0 = pneg %p4149_p12 }
  0x64   : > { %p4156_p13 = por %p4155_p8, %p4154_p4 }
  0x66   : > { %p4157_p6 = pnand %p4156_p13, %p4150_p0 }
  0x68   : > { %4160 = shalt.err (!%p4157_p6)
}
  0x69   : > { %s4161_s20 = scalar_lea.vmem %s4473_s10, 4096  ;;  %s4257_s15 = smov [#allocation2]  }
  0x6a   : > { %p4162_p10 = scmp.ne.s32.totalorder %s4473_s10, %s4161_s20  ;;  %s4166_s29 = sshll.u32 %s4257_s15, 4  ;;  %s4167_s29 = int_to_ptr.vmem [resolvable:$false] %s4166_s29 }
  0x6b   : > { %s4168_s12 = scalar_lea.vmem %s4167_s29, 8192  ;;  %p4169_p12 = scmp.lt.s32.totalorder %s4473_s10, %s4167_s29 }
  0x6c   : > { %p4164_p3 = pnand %p4162_p10, %p4148_p9  ;;  %p4170_p1 = scmp.lt.s32.totalorder %s4168_s12, %s4161_s20 }
  0x6e   : > { %p4165_p7 = pneg %p4164_p3  ;;  %p4171_p2 = por %p4170_p1, %p4169_p12 }
  0x70   : > { %p4172_p4 = pnand %p4171_p2, %p4165_p7 }
  0x72   : > { %4175 = shalt.err (!%p4172_p4)
}
  0x73   : > { %s4258_s8 = smov 128   ;;  %s4259_s17 = smov 8  }
  0x74   : > { %3887 = dma.hbm_to_vmem [thread:$0]  (!%p4469_p11), %s4467_s23, 4096, %s4473_s10, %s4475_s14, %s4258_s8, %s4258_s8, %s4259_s17  }
  0x75   : > { %p5516_p9 = scmp.ne.s32.totalorder %s5510_s9, 0 }
  0x77   : > { %292 = sbr.rel (%p5516_p9) target bundleno = 1168 (0x490), region = 48 }
  0x7e   : > { %s4506_s21 = sand.u32 1, %s4242_s25   ;;  %p5517_p0 = scmp.ne.s32.totalorder %s5507_s30, 0 }
  0x7f   : > { %s3075_s16 = sshll.u32 %s4506_s21, 8  ;;  %s295_s13 = scalar_lea.sflag [#allocation3], %s4506_s21 }
  0x80   : > { %s4512_s20 = scalar_lea.vmem [#allocation2], %s3075_s16 }
  0x81   : > { %4221 = dma.done.wait (%p5517_p0), %s295_s13, 4096  }
  0x82   : > { %4223 = vsyncadd (%p5517_p0), %s295_s13, 4294963200  ;;  %p5518_p11 = scmp.eq.s32.totalorder %s4325_s28, 0 }
  0x84   : > { %4225 = dma.done.wait (%p5518_p11), [#allocation6], 10240   ;;  %p5519_p8 = pmov %p5518_p11 }
  0x86   : > { %4227 = vsyncadd (%p5519_p8), [#allocation6], 4294957056  ;;  %p5520_p13 = pmov %p5519_p8 }
  0x87   : > { %p5521_p6 = pmov %p5519_p8 }
  0x88   : > { %4229 = dma.done.wait (%p5520_p13), [#allocation9], 1024  }
  0x89   : > { %4231 = vsyncadd (%p5521_p6), [#allocation9], 4294966272  ;;  %v3942_v0 = vld [vmem:[#allocation5] sm:$0xff]   ;;  %v3943_v1 = vld [vmem:[#allocation5 + $0x8] sm:$0xff]   ;;  %vm823_vm0 = vcmask 1040384   ;;  %vm1101_vm4 = vcmask 1046528  }
  0x8a   : > { %3698 = vmatprep.subr.bf16.mxu0 %v3942_v0  ;;  %3842 = vmatprep.subr.bf16.mxu1 %v3942_v0  ;;  %v3944_v2 = vld [vmem:[#allocation5 + $0x10] sm:$0xff]   ;;  %v3945_v3 = vld [vmem:[#allocation5 + $0x18] sm:$0xff]   ;;  %v342_v4 = vld [vmem:[%s4512_s20] sm:$0xff]  ;;  %vm824_vm1 = vsmask.f32 256  ;;  %s5353_s15 = scalar_lea.vmem [#allocation10], %s3075_s16 }
  0x8b   : > { %3699 = vmatpush3.bf16.msra.mxu0 %v3942_v0  ;;  %3850 = vmatpush3.bf16.msra.mxu1 %v3942_v0  ;;  %v343_v5 = vld [vmem:[%s4512_s20 + $0x8] sm:$0xff]  ;;  %v3946_v7 = vld [vmem:[#allocation5 + $0x20] sm:$0xff]   ;;  %v3948_v12 = vld [vmem:[#allocation5 + $0x30] sm:$0xff]   ;;  %vm860_vm3 = vsmask.f32 7424  ;;  %s3177_s29 = sshll.u32 %s4325_s28, 12 }
  0x8c   : > { %3700 = vmatprep.subr.bf16.mxu0 %v3943_v1  ;;  %3843 = vmatprep.subr.bf16.mxu1 %v3943_v1  ;;  %v374_v6 = vpack.c.bf16 %v343_v5, %v342_v4  ;;  %v358_v8 = vld [vmem:[%s4512_s20 + $0x80] sm:$0xff]  ;;  %v359_v9 = vld [vmem:[%s4512_s20 + $0x88] sm:$0xff]  ;;  %v3949_v13 = vld [vmem:[#allocation5 + $0x38] sm:$0xff]   ;;  %s2963_s12 = sshll.u32 %s5353_s15, 4  ;;  %s5445_s16 = scalar_lea.hbm %s5501_s7, %s3177_s29  ;;  %s5447_s12 = int_to_ptr.vmem [resolvable:$true] %s2963_s12 }
  0x8d   : > { %v382_v10 = vpack.c.bf16 %v359_v9, %v358_v8  ;;  %v3947_v11 = vld [vmem:[#allocation5 + $0x28] sm:$0xff]   ;;  %v344_v14 = vld [vmem:[%s4512_s20 + $0x10] sm:$0xff]  ;;  %v345_v15 = vld [vmem:[%s4512_s20 + $0x18] sm:$0xff]  ;;  %s2950_s28 = scalar_lea.sflag [#allocation4], %s4506_s21  ;;  %s4176_s13 = scalar_lea.vmem %s5447_s12, 4096 }
  0x8e   : > { %3714 = vmatprep.mubr.bf16.mxu0 %v374_v6  ;;  %v346_v16 = vld [vmem:[%s4512_s20 + $0x20] sm:$0xff]  ;;  %v347_v17 = vld [vmem:[%s4512_s20 + $0x28] sm:$0xff]  ;;  %v360_v18 = vld [vmem:[%s4512_s20 + $0x90] sm:$0xff]  ;;  %v375_v24 = vpack.c.bf16 %v345_v15, %v344_v14  ;;  %v4260_v14 = vmov 0   ;;  %p4177_p10 = scmp.ne.s32.totalorder %s5447_s12, %s4176_s13 }
  0x8f   : > { %3701 = vmatpush3.bf16.msra.mxu0 %v3943_v1  ;;  %3851 = vmatpush3.bf16.msra.mxu1 %v3943_v1  ;;  %v361_v19 = vld [vmem:[%s4512_s20 + $0x98] sm:$0xff]  ;;  %v362_v20 = vld [vmem:[%s4512_s20 + $0xa0] sm:$0xff]  ;;  %v363_v21 = vld [vmem:[%s4512_s20 + $0xa8] sm:$0xff]  ;;  %v376_v25 = vpack.c.bf16 %v347_v17, %v346_v16  ;;  %v673_v15 = vrot.slane %v4260_v14, 7 }
  0x90   : > { %3702 = vmatprep.subr.bf16.mxu0 %v3944_v2  ;;  %3844 = vmatprep.subr.bf16.mxu1 %v3944_v2  ;;  %v3953_v22 = vld [vmem:[#allocation7 + $0xc0] sm:$0xff]   ;;  %v383_v26 = vpack.c.bf16 %v361_v19, %v360_v18  ;;  %v384_v28 = vpack.c.bf16 %v363_v21, %v362_v20  ;;  %v3952_v29 = vld [vmem:[#allocation7 + $0x48] sm:$0xff]   ;;  %v348_v30 = vld [vmem:[%s4512_s20 + $0x30] sm:$0xff]  ;;  %p4178_p3 = pnand %p4177_p10, %p4458_p5 }
  0x91   : > { %3730 = vmatprep.mubr.bf16.mxu1 %v382_v10  ;;  %v3950_v23 = vld [vmem:[#allocation7 + $0x40] sm:$0xff]   ;;  %v349_v31 = vld [vmem:[%s4512_s20 + $0x38] sm:$0xff]  ;;  %v351_v34 = vld [vmem:[%s4512_s20 + $0x48] sm:$0xff] }
  0x92   : > { %v3951_v27 = vld [vmem:[#allocation7] sm:$0xff]   ;;  %v364_v35 = vld [vmem:[%s4512_s20 + $0xb0] sm:$0xff]  ;;  %v365_v36 = vld [vmem:[%s4512_s20 + $0xb8] sm:$0xff]  ;;  %v377_v44 = vpack.c.bf16 %v349_v31, %v348_v30  ;;  %p4179_p7 = pneg %p4178_p3 }
  0x93   : > { %3703 = vmatpush3.bf16.msra.mxu0 %v3944_v2  ;;  %3852 = vmatpush3.bf16.msra.mxu1 %v3944_v2  ;;  %v3955_v32 = vld [vmem:[#allocation7 + $0x80] sm:$0xff]   ;;  %v3954_v37 = vld [vmem:[#allocation7 + $0x8] sm:$0xff]   ;;  %v3956_v41 = vld [vmem:[#allocation7 + $0x50] sm:$0xff]   ;;  %v385_v47 = vpack.c.bf16 %v365_v36, %v364_v35 }
  0x94   : > { %3704 = vmatprep.subr.bf16.mxu0 %v3945_v3  ;;  %3845 = vmatprep.subr.bf16.mxu1 %v3945_v3  ;;  %v350_v33 = vld [vmem:[%s4512_s20 + $0x40] sm:$0xff]  ;;  %v3957_v38 = vld [vmem:[#allocation7 + $0xc8] sm:$0xff]   ;;  %v3961_v43 = vld [vmem:[#allocation7 + $0xd0] sm:$0xff]  }
  0x95   : > { %v366_v39 = vld [vmem:[%s4512_s20 + $0xc0] sm:$0xff]  ;;  %v367_v40 = vld [vmem:[%s4512_s20 + $0xc8] sm:$0xff]  ;;  %v3958_v45 = vld [vmem:[#allocation7 + $0x10] sm:$0xff]   ;;  %v378_v46 = vpack.c.bf16 %v351_v34, %v350_v33 }
  0x96   : > { %v3959_v42 = vld [vmem:[#allocation7 + $0x88] sm:$0xff]   ;;  %v3960_v48 = vld [vmem:[#allocation7 + $0x58] sm:$0xff]   ;;  %v3963_v49 = vld [vmem:[#allocation7 + $0x90] sm:$0xff]   ;;  %v386_v50 = vpack.c.bf16 %v367_v40, %v366_v39 }
  0x97   : > { %3705 = vmatpush3.bf16.msra.mxu0 %v3945_v3  ;;  %3853 = vmatpush3.bf16.msra.mxu1 %v3945_v3  ;;  %v3965_v51 = vld [vmem:[#allocation7 + $0xd8] sm:$0xff]   ;;  %v352_v52 = vld [vmem:[%s4512_s20 + $0x50] sm:$0xff]  ;;  %v354_v54 = vld [vmem:[%s4512_s20 + $0x60] sm:$0xff] }
  0x98   : > { %3706 = vmatprep.subr.bf16.mxu0 %v3946_v7  ;;  %3846 = vmatprep.subr.bf16.mxu1 %v3946_v7  ;;  %v353_v53 = vld [vmem:[%s4512_s20 + $0x58] sm:$0xff]  ;;  %v355_v55 = vld [vmem:[%s4512_s20 + $0x68] sm:$0xff]  ;;  %v368_v56 = vld [vmem:[%s4512_s20 + $0xd0] sm:$0xff] }
  0x99   : > { %v369_v57 = vld [vmem:[%s4512_s20 + $0xd8] sm:$0xff]  ;;  %v370_v59 = vld [vmem:[%s4512_s20 + $0xe0] sm:$0xff]  ;;  %v371_v60 = vld [vmem:[%s4512_s20 + $0xe8] sm:$0xff]  ;;  %v379_v63 = vpack.c.bf16 %v353_v53, %v352_v52  ;;  %v380_v1 = vpack.c.bf16 %v355_v55, %v354_v54 }
  0x9a   : > { %v3962_v58 = vld [vmem:[#allocation7 + $0x18] sm:$0xff]   ;;  %v3964_v61 = vld [vmem:[#allocation7 + $0x60] sm:$0xff]   ;;  %v387_v2 = vpack.c.bf16 %v369_v57, %v368_v56  ;;  %v388_v3 = vpack.c.bf16 %v371_v60, %v370_v59  ;;  %v356_v4 = vld [vmem:[%s4512_s20 + $0x70] sm:$0xff] }
  0x9b   : > { %3707 = vmatpush3.bf16.msra.mxu0 %v3946_v7  ;;  %3854 = vmatpush3.bf16.msra.mxu1 %v3946_v7  ;;  %v3967_v62 = vld [vmem:[#allocation7 + $0x98] sm:$0xff]   ;;  %v3966_v0 = vld [vmem:[#allocation7 + $0x20] sm:$0xff]   ;;  %v372_v6 = vld [vmem:[%s4512_s20 + $0xf0] sm:$0xff] }
  0x9c   : > { %3708 = vmatprep.subr.bf16.mxu0 %v3947_v11  ;;  %3847 = vmatprep.subr.bf16.mxu1 %v3947_v11  ;;  %v357_v5 = vld [vmem:[%s4512_s20 + $0x78] sm:$0xff]  ;;  %v3968_v10 = vld [vmem:[#allocation7 + $0x68] sm:$0xff]   ;;  %vm4558_vm2 = vmand %vm823_vm0, %vm824_vm1 }
  0x9d   : > { %v373_v7 = vld [vmem:[%s4512_s20 + $0xf8] sm:$0xff]  ;;  %v381_v8 = vpack.c.bf16 %v357_v5, %v356_v4  ;;  %v3972_v17 = vld [vmem:[#allocation7 + $0x70] sm:$0xff]   ;;  %v3973_v18 = vld [vmem:[#allocation7 + $0xe8] sm:$0xff]   ;;  %v4564_v21 = vsel %vm4558_vm2, 0, %v673_v15 }
  0x9e   : > { %v389_v9 = vpack.c.bf16 %v373_v7, %v372_v6  ;;  %v3974_v19 = vld [vmem:[#allocation7 + $0x30] sm:$0xff]   ;;  %v3975_v20 = vld [vmem:[#allocation7 + $0xa8] sm:$0xff]   ;;  %v3980_v34 = vld [vmem:[#allocation7 + $0xf8] sm:$0xff]  }
  0x9f   : > { %3709 = vmatpush3.bf16.msra.mxu0 %v3947_v11  ;;  %3855 = vmatpush3.bf16.msra.mxu1 %v3947_v11  ;;  %v3969_v11 = vld [vmem:[#allocation7 + $0xe0] sm:$0xff]   ;;  %v3979_v30 = vld [vmem:[#allocation7 + $0xb0] sm:$0xff]   ;;  %v3981_v35 = vld [vmem:[#allocation7 + $0xb8] sm:$0xff]  }
  0xa0   : > { %3710 = vmatprep.subr.bf16.mxu0 %v3948_v12  ;;  %3848 = vmatprep.subr.bf16.mxu1 %v3948_v12  ;;  %v3982_v36 = vld [vmem:[#allocation7 + $0x140] sm:$0xff]   ;;  %v3985_v39 = vld [vmem:[#allocation7 + $0x108] sm:$0xff]   ;;  %v3986_v40 = vld [vmem:[#allocation7 + $0x150] sm:$0xff]  }
  0xa1   : > { %v4581_v52 = vld [vmem:[%s5496_s2] ss:$0 sm:$0xff]  ;;  %v4005_v57 = vld [vmem:[#allocation7 + $0x138] sm:$0xff]  }
  0xa3   : > { %3711 = vmatpush3.bf16.msra.mxu0 %v3948_v12  ;;  %3856 = vmatpush3.bf16.msra.mxu1 %v3948_v12  ;;  %v3970_v12 = vld [vmem:[#allocation7 + $0x28] sm:$0xff]  }
  0xa4   : > { %3712 = vmatprep.subr.bf16.mxu0 %v3949_v13  ;;  %3849 = vmatprep.subr.bf16.mxu1 %v3949_v13 }
  0xa7   : > { %3713 = vmatpush3.bf16.msra.mxu0 %v3949_v13  ;;  %3857 = vmatpush3.bf16.msra.mxu1 %v3949_v13  ;;  %v3971_v13 = vld [vmem:[#allocation7 + $0xa0] sm:$0xff]  }
  0xa8   : > { %3314 = vmatprep.subr.bf16.mxu0 %v3953_v22  ;;  %3202 = vmatprep.subr.bf16.mxu1 %v3950_v23  ;;  %v864_v22 = vshll.u32 %v4564_v21, 16  ;;  %v4569_v23 = vsel %vm4558_vm2, %v673_v15, 0 }
  0xaa   : > { %3715 = vmatmul.mubr.bf16.vlgmr.msra.gmra.mrb[0].mxu0 %v375_v24  ;;  %3731 = vmatmul.mubr.bf16.vlgmr.msra.gmra.mrb[0].mxu1 %v383_v26  ;;  %v3976_v24 = vld [vmem:[#allocation7 + $0x78] sm:$0xff]   ;;  %v862_v26 = vshrl.u32 %v4564_v21, 16 }
  0xab   : > { %3718 = vmatprep.mubr.bf16.mxu0 %v376_v25  ;;  %3734 = vmatprep.mubr.bf16.mxu1 %v384_v28  ;;  %v3977_v25 = vld [vmem:[#allocation7 + $0xf0] sm:$0xff]   ;;  %v869_v28 = vshll.u32 %v4569_v23, 16 }
  0xac   : > { %3203 = vmatpush3.bf16.msra.mxu1 %v3951_v27  ;;  %3315 = vmatpush3.bf16.msra.mxu0 %v3955_v32  ;;  %v866_v27 = vrot.slane %v864_v22, 1 }
  0xad   : > { %3204 = vmatprep.subr.bf16.mxu1 %v3952_v29  ;;  %3316 = vmatprep.subr.bf16.mxu0 %v3957_v38  ;;  %v3978_v29 = vld [vmem:[#allocation7 + $0x38] sm:$0xff]   ;;  %v871_v32 = vrot.slane %v869_v28, 1  ;;  %v3984_v38 = vld [vmem:[#allocation7 + $0x148] sm:$0xff]  }
  0xae   : > { %v867_v31 = vor.u32 %v866_v27, %v862_v26 }
  0xb0   : > { %3205 = vmatpush3.bf16.msra.mxu1 %v3954_v37  ;;  %3317 = vmatpush3.bf16.msra.mxu0 %v3959_v42  ;;  %v4574_v33 = vsel %vm860_vm3, %v867_v31, %v871_v32  ;;  %v3983_v37 = vld [vmem:[#allocation7 + $0x100] sm:$0xff]   ;;  %v3988_v42 = vld [vmem:[#allocation7 + $0x158] sm:$0xff]  }
  0xb1   : > { %3206 = vmatprep.subr.bf16.mxu1 %v3956_v41  ;;  %3318 = vmatprep.subr.bf16.mxu0 %v3961_v43  ;;  %v3987_v41 = vld [vmem:[#allocation7 + $0x110] sm:$0xff]   ;;  %v3989_v43 = vld [vmem:[#allocation7 + $0x118] sm:$0xff]  }
  0xb2   : > { %3719 = vmatmul.mubr.bf16.gmra.mrb[4].mxu0 %v377_v44  ;;  %3735 = vmatmul.mubr.bf16.gmra.mrb[4].mxu1 %v385_v47  ;;  %v3990_v44 = vld [vmem:[#allocation7 + $0x1c0] sm:$0xff]   ;;  %v3996_v47 = vld [vmem:[#allocation7 + $0x168] sm:$0xff]  }
  0xb3   : > { %3722 = vmatprep.mubr.bf16.mxu0 %v378_v46  ;;  %3738 = vmatprep.mubr.bf16.mxu1 %v386_v50  ;;  %v3993_v46 = vld [vmem:[#allocation7 + $0x120] sm:$0xff]   ;;  %v4001_v50 = vld [vmem:[#allocation7 + $0x130] sm:$0xff]  }
  0xb4   : > { %3207 = vmatpush3.bf16.msra.mxu1 %v3958_v45  ;;  %3319 = vmatpush3.bf16.msra.mxu0 %v3963_v49  ;;  %v3992_v45 = vld [vmem:[#allocation7 + $0x160] sm:$0xff]   ;;  %v4000_v49 = vld [vmem:[#allocation7 + $0x170] sm:$0xff]  }
  0xb5   : > { %3208 = vmatprep.subr.bf16.mxu1 %v3960_v48  ;;  %3320 = vmatprep.subr.bf16.mxu0 %v3965_v51  ;;  %v3997_v48 = vld [vmem:[#allocation7 + $0x128] sm:$0xff]   ;;  %v4004_v51 = vld [vmem:[#allocation7 + $0x178] sm:$0xff]  }
  0xb8   : > { %3209 = vmatpush3.bf16.msra.mxu1 %v3962_v58  ;;  %3321 = vmatpush3.bf16.msra.mxu0 %v3967_v62 }
  0xb9   : > { %3210 = vmatprep.subr.bf16.mxu1 %v3964_v61  ;;  %3322 = vmatprep.subr.bf16.mxu0 %v3969_v11 }
  0xba   : > { %3723 = vmatmul.mubr.bf16.gmra.mrb[8].mxu0 %v379_v63  ;;  %3739 = vmatmul.mubr.bf16.gmra.mrb[8].mxu1 %v387_v2 }
  0xbb   : > { %3726 = vmatprep.mubr.bf16.mxu0 %v380_v1  ;;  %3742 = vmatprep.mubr.bf16.mxu1 %v388_v3 }
  0xbc   : > { %3211 = vmatpush3.bf16.msra.mxu1 %v3966_v0  ;;  %3323 = vmatpush3.bf16.msra.mxu0 %v3971_v13 }
  0xbd   : > { %3212 = vmatprep.subr.bf16.mxu1 %v3968_v10  ;;  %3324 = vmatprep.subr.bf16.mxu0 %v3973_v18 }
  0xc0   : > { %3213 = vmatpush3.bf16.msra.mxu1 %v3970_v12  ;;  %3325 = vmatpush3.bf16.msra.mxu0 %v3975_v20 }
  0xc1   : > { %3214 = vmatprep.subr.bf16.mxu1 %v3972_v17  ;;  %3326 = vmatprep.subr.bf16.mxu0 %v3977_v25 }
  0xc2   : > { %3727 = vmatmul.mubr.bf16.gmra.mrb[12].mxu0 %v381_v8  ;;  %3743 = vmatmul.mubr.bf16.gmra.mrb[12].mxu1 %v389_v9 }
  0xc3   : > { %1800 = vmatprep.mubr.bf16.mxu1 %v4574_v33 }
  0xc4   : > { %3215 = vmatpush3.bf16.msra.mxu1 %v3974_v19  ;;  %3327 = vmatpush3.bf16.msra.mxu0 %v3979_v30  ;;  %v1102_v30 = vrot.slane %v4564_v21, 1 }
  0xc5   : > { %3216 = vmatprep.subr.bf16.mxu1 %v3976_v24  ;;  %3328 = vmatprep.subr.bf16.mxu0 %v3980_v34  ;;  %v1103_v24 = vrot.slane %v4569_v23, 1 }
  0xc8   : > { %3217 = vmatpush3.bf16.msra.mxu1 %v3978_v29  ;;  %3329 = vmatpush3.bf16.msra.mxu0 %v3981_v35 }
  0xc9   : > { %3426 = vmatprep.subr.bf16.mxu1 %v3982_v36  ;;  %3538 = vmatprep.subr.bf16.mxu0 %v3990_v44 }
  0xcb   : > { %1801 = vmatmul.mubr.bf16.vlgmr.msra.gmra.mrb[16].mxu1 %v4564_v21 }
  0xcc   : > { %3427 = vmatpush3.bf16.msra.mxu1 %v3983_v37 }
  0xcd   : > { %3428 = vmatprep.subr.bf16.mxu1 %v3984_v38 }
  0xd0   : > { %3429 = vmatpush3.bf16.msra.mxu1 %v3985_v39 }
  0xd1   : > { %3430 = vmatprep.subr.bf16.mxu1 %v3986_v40 }
  0xd4   : > { %3431 = vmatpush3.bf16.msra.mxu1 %v3987_v41 }
  0xd5   : > { %3432 = vmatprep.subr.bf16.mxu1 %v3988_v42 }
  0xd8   : > { %3433 = vmatpush3.bf16.msra.mxu1 %v3989_v43 }
  0xd9   : > { %3434 = vmatprep.subr.bf16.mxu1 %v3992_v45 }
  0xdc   : > { %3435 = vmatpush3.bf16.msra.mxu1 %v3993_v46  ;;  %v4613_v46 = vld [vmem:[#allocation7 + $0x200] sm:$0xff]  }
  0xdd   : > { %3436 = vmatprep.subr.bf16.mxu1 %v3996_v47 }
  0xe0   : > { %3437 = vmatpush3.bf16.msra.mxu1 %v3997_v48 }
  0xe1   : > { %3438 = vmatprep.subr.bf16.mxu1 %v4000_v49 }
  0xe4   : > { %3439 = vmatpush3.bf16.msra.mxu1 %v4001_v50 }
  0xe5   : > { %3440 = vmatprep.subr.bf16.mxu1 %v4004_v51  ;;  %v4618_v51 = vsel %vm1101_vm4, %v1102_v30, %v1103_v24 }
  0xe6   : > { %5524 = vst [vmem:[#allocation16_spill] sm:$0xff] %v4618_v51 }
  0xe8   : > { %3441 = vmatpush3.bf16.msra.mxu1 %v4005_v57 }
  0xe9   : > { %3746 = vmatprep.subr.bf16.mxu1 %v4613_v46 }
 0x17d   : > { %v3716_v53 = vpop.f32.mrb[0].mxu0  ;;  %v3732_v56 = vpop.f32.mrb[0].mxu1 }
 0x17e   : > { %v504_v54 = vadd.f32 %v3716_v53, %v4581_v52  ;;  %v495_v55 = vpop.f32.mrb[1].mxu0  ;;  %v568_v60 = vadd.f32 %v3732_v56, %v4581_v52  ;;  %v559_v61 = vpop.f32.mrb[1].mxu1 }
 0x17f   : > { %v496_v58 = vadd.f32 %v4581_v52, %v495_v55  ;;  %v3717_v59 = vpop.f32.mrb[2].mxu0  ;;  %v560_v0 = vadd.f32 %v4581_v52, %v559_v61  ;;  %v3733_v1 = vpop.f32.mrb[2].mxu1 }
 0x180   : > { %v507_v62 = vadd.f32 %v3717_v59, %v4581_v52  ;;  %v498_v63 = vpop.f32.mrb[3].mxu0  ;;  %v640_v3 = vmax.f32 %v568_v60, 0.0  ;;  %v571_v4 = vadd.f32 %v3733_v1, %v4581_v52  ;;  %v562_v5 = vpop.f32.mrb[3].mxu1  ;;  %v624_v6 = vmax.f32 %v504_v54, 0.0  ;;  %v3991_v54 = vld [vmem:[#allocation7 + $0x180] sm:$0xff]   ;;  %v3994_v60 = vld [vmem:[#allocation7 + $0x1c8] sm:$0xff]  }
 0x181   : > { %v499_v2 = vadd.f32 %v4581_v52, %v498_v63  ;;  %v638_v8 = vmax.f32 %v560_v0, 0.0  ;;  %v563_v9 = vadd.f32 %v4581_v52, %v562_v5  ;;  %v622_v10 = vmax.f32 %v496_v58, 0.0 }
 0x182   : > { %v625_v7 = vmax.f32 %v507_v62, 0.0  ;;  %v641_v12 = vmax.f32 %v571_v4, 0.0 }
 0x183   : > { %v623_v11 = vmax.f32 %v499_v2, 0.0  ;;  %v639_v14 = vmax.f32 %v563_v9, 0.0 }
 0x184   : > { %v655_v13 = vpack.c.bf16 %v625_v7, %v624_v6  ;;  %v4591_v18 = vpack.c.bf16 %v641_v12, %v640_v3 }
 0x185   : > { %v654_v15 = vpack.c.bf16 %v623_v11, %v622_v10  ;;  %v3720_v17 = vpop.f32.mrb[4].mxu0  ;;  %v4595_v25 = vpack.c.bf16 %v639_v14, %v638_v8  ;;  %v4597_v26 = vpop.f32.mrb[4].mxu1 }
 0x186   : > { %v685_v19 = vshrl.u32 %v655_v13, 16  ;;  %v520_v20 = vadd.f32 %v3720_v17, %v4581_v52  ;;  %v511_v22 = vpop.f32.mrb[5].mxu0  ;;  %v4601_v31 = vpop.f32.mrb[5].mxu1  ;;  %v688_v34 = vshll.u32 %v655_v13, 16 }
 0x187   : > { %v678_v27 = vshrl.u32 %v654_v15, 16  ;;  %v512_v28 = vadd.f32 %v4581_v52, %v511_v22  ;;  %v3721_v29 = vpop.f32.mrb[6].mxu0  ;;  %v4604_v23 = vpop.f32.mrb[6].mxu1  ;;  %v681_v39 = vshll.u32 %v654_v15, 16  ;;  %v3995_v15 = vld [vmem:[#allocation7 + $0x188] sm:$0xff]  }
 0x188   : > { %v687_v32 = vrot.slane %v685_v19, 7  ;;  %v628_v35 = vmax.f32 %v520_v20, 0.0  ;;  %v523_v36 = vadd.f32 %v3721_v29, %v4581_v52  ;;  %v514_v37 = vpop.f32.mrb[7].mxu0  ;;  %v4607_v42 = vpop.f32.mrb[7].mxu1 }
 0x189   : > { %v680_v38 = vrot.slane %v678_v27, 7  ;;  %v626_v40 = vmax.f32 %v512_v28, 0.0  ;;  %v515_v41 = vadd.f32 %v4581_v52, %v514_v37  ;;  %v3998_v27 = vld [vmem:[#allocation7 + $0x1d0] sm:$0xff]  }
 0x18a   : > { %v690_v43 = vor.u32 %v688_v34, %v687_v32  ;;  %v4611_v44 = vsel %vm4558_vm2, %v687_v32, 0  ;;  %v629_v45 = vmax.f32 %v523_v36, 0.0 }
 0x18b   : > { %v683_v47 = vor.u32 %v681_v39, %v680_v38  ;;  %v844_v48 = vsel %vm4558_vm2, %v680_v38, 0  ;;  %v627_v49 = vmax.f32 %v515_v41, 0.0  ;;  %v893_v59 = vshll.u32 %v4611_v44, 16 }
 0x18c   : > { %v657_v50 = vpack.c.bf16 %v629_v45, %v628_v35  ;;  %v4622_v53 = vsel %vm4558_vm2, 0, %v690_v43  ;;  %v881_v0 = vshll.u32 %v844_v48, 16  ;;  %v1106_v22 = vrot.slane %v844_v48, 1  ;;  %v3999_v43 = vld [vmem:[#allocation7 + $0x190] sm:$0xff]  }
 0x18d   : > { %v656_v55 = vpack.c.bf16 %v627_v49, %v626_v40  ;;  %v827_v56 = vsel %vm4558_vm2, 0, %v683_v47  ;;  %v3724_v57 = vpop.f32.mrb[8].mxu0  ;;  %v888_v58 = vshll.u32 %v4622_v53, 16  ;;  %v4629_v2 = vpop.f32.mrb[8].mxu1  ;;  %v886_v19 = vshrl.u32 %v4622_v53, 16 }
 0x18e   : > { %v699_v61 = vshrl.u32 %v657_v50, 16  ;;  %v702_v62 = vshll.u32 %v657_v50, 16  ;;  %1961 = vmatprep.mubr.bf16.mxu0 %v827_v56  ;;  %v876_v63 = vshll.u32 %v827_v56, 16  ;;  %v527_v1 = vpop.f32.mrb[9].mxu0  ;;  %v874_v5 = vshrl.u32 %v827_v56, 16  ;;  %v4633_v8 = vpop.f32.mrb[9].mxu1 }
 0x18f   : > { %v692_v3 = vshrl.u32 %v656_v55, 16  ;;  %v695_v4 = vshll.u32 %v656_v55, 16  ;;  %1962 = vmatmul.mubr.bf16.vlgmr.msra.gmra.mrb[16].mxu0 %v4618_v51  ;;  %v536_v6 = vadd.f32 %v3724_v57, %v4581_v52  ;;  %v3725_v7 = vpop.f32.mrb[10].mxu0  ;;  %v528_v11 = vadd.f32 %v4581_v52, %v527_v1  ;;  %v4639_v14 = vpop.f32.mrb[10].mxu1  ;;  %v4002_v50 = vld [vmem:[#allocation7 + $0x1d8] sm:$0xff]  }
 0x190   : > { %v4635_v9 = vrot.slane %v699_v61, 7  ;;  %1969 = vmatprep.mubr.bf16.mxu0 %v4622_v53  ;;  %v878_v10 = vrot.slane %v876_v63, 1  ;;  %v890_v12 = vrot.slane %v888_v58, 1  ;;  %v530_v13 = vpop.f32.mrb[11].mxu0  ;;  %3539 = vmatpush3.bf16.msra.mxu0 %v3991_v54  ;;  %v1105_v20 = vrot.slane %v827_v56, 1  ;;  %v4642_v24 = vpop.f32.mrb[11].mxu1 }
 0x191   : > { %v694_v17 = vrot.slane %v692_v3, 7  ;;  %3540 = vmatprep.subr.bf16.mxu0 %v3994_v60  ;;  %v883_v29 = vrot.slane %v881_v0, 1  ;;  %v632_v30 = vmax.f32 %v536_v6, 0.0  ;;  %v895_v32 = vrot.slane %v893_v59, 1 }
 0x192   : > { %v879_v28 = vor.u32 %v878_v10, %v874_v5  ;;  %v704_v34 = vor.u32 %v702_v62, %v4635_v9  ;;  %v891_v37 = vor.u32 %v890_v12, %v886_v19  ;;  %v630_v39 = vmax.f32 %v528_v11, 0.0  ;;  %v4003_v10 = vld [vmem:[#allocation7 + $0x198] sm:$0xff]  }
 0x193   : > { %v697_v35 = vor.u32 %v695_v4, %v694_v17  ;;  %v4647_v36 = vsel %vm4558_vm2, %v694_v17, 0  ;;  %v539_v40 = vadd.f32 %v3725_v7, %v4581_v52  ;;  %v531_v41 = vadd.f32 %v4581_v52, %v530_v13 }
 0x194   : > { %v4650_v38 = vsel %vm860_vm3, %v879_v28, %v883_v29  ;;  %3541 = vmatpush3.bf16.msra.mxu0 %v3995_v15  ;;  %v4656_v45 = vsel %vm1101_vm4, %v1105_v20, %v1106_v22  ;;  %v905_v48 = vshll.u32 %v4647_v36, 16  ;;  %v4664_v54 = vsel %vm860_vm3, %v891_v37, %v895_v32  ;;  %v4006_v15 = vld [vmem:[#allocation7 + $0x1e0] sm:$0xff]  }
 0x195   : > { %1808 = vmatprep.mubr.bf16.mxu1 %v4650_v38  ;;  %v4660_v47 = vsel %vm4558_vm2, 0, %v697_v35  ;;  %v3728_v49 = vpop.f32.mrb[12].mxu0  ;;  %3542 = vmatprep.subr.bf16.mxu0 %v3998_v27  ;;  %v633_v55 = vmax.f32 %v539_v40, 0.0  ;;  %v631_v57 = vmax.f32 %v531_v41, 0.0  ;;  %v4667_v60 = vpop.f32.mrb[12].mxu1  ;;  %v1108_v62 = vrot.slane %v4622_v53, 1 }
 0x196   : > { %1809 = vmatmul.mubr.bf16.gmra.mrb[20].mxu1 %v827_v56  ;;  %v900_v58 = vshll.u32 %v4660_v47, 16  ;;  %v543_v59 = vpop.f32.mrb[13].mxu0  ;;  %v898_v61 = vshrl.u32 %v4660_v47, 16  ;;  %v4675_v56 = vsel %vm4558_vm2, 0, %v704_v34  ;;  %v4677_v0 = vpop.f32.mrb[13].mxu1  ;;  %v552_v5 = vadd.f32 %v3728_v49, %v4581_v52  ;;  %v4007_v35 = vld [vmem:[#allocation7 + $0x1a0] sm:$0xff]  }
 0x197   : > { %1816 = vmatprep.mubr.bf16.mxu1 %v4664_v54  ;;  %1970 = vmatmul.mubr.bf16.gmra.mrb[20].mxu0 %v4656_v45  ;;  %v3729_v63 = vpop.f32.mrb[14].mxu0  ;;  %v659_v1 = vpack.c.bf16 %v633_v55, %v632_v30  ;;  %v658_v3 = vpack.c.bf16 %v631_v57, %v630_v39  ;;  %v4681_v7 = vpop.f32.mrb[14].mxu1  ;;  %v907_v11 = vrot.slane %v905_v48, 1  ;;  %v544_v12 = vadd.f32 %v4581_v52, %v543_v59 }
 0x198   : > { %1977 = vmatprep.mubr.bf16.mxu0 %v4660_v47  ;;  %v902_v4 = vrot.slane %v900_v58, 1  ;;  %v546_v6 = vpop.f32.mrb[15].mxu0  ;;  %3543 = vmatpush3.bf16.msra.mxu0 %v3999_v43  ;;  %v4684_v13 = vpop.f32.mrb[15].mxu1  ;;  %v1109_v20 = vrot.slane %v4611_v44, 1  ;;  %v912_v22 = vshll.u32 %v4675_v56, 16  ;;  %v4691_v27 = vsel %vm4558_vm2, %v4635_v9, 0 }
 0x199   : > { %3544 = vmatprep.subr.bf16.mxu0 %v4002_v50  ;;  %v706_v17 = vshrl.u32 %v658_v3, 16  ;;  %v709_v19 = vshll.u32 %v658_v3, 16  ;;  %v713_v28 = vshrl.u32 %v659_v1, 16  ;;  %v636_v34 = vmax.f32 %v552_v5, 0.0  ;;  %v4008_v9 = vld [vmem:[#allocation7 + $0x1e8] sm:$0xff]  }
 0x19a   : > { %v903_v29 = vor.u32 %v902_v4, %v898_v61  ;;  %v4694_v32 = vsel %vm1101_vm4, %v1108_v62, %v1109_v20  ;;  %v634_v44 = vmax.f32 %v544_v12, 0.0  ;;  %v555_v39 = vadd.f32 %v3729_v63, %v4581_v52  ;;  %v4009_v61 = vld [vmem:[#allocation7 + $0x1a8] sm:$0xff]   ;;  %v4010_v4 = vld [vmem:[#allocation7 + $0x1f0] sm:$0xff]  }
 0x19b   : > { %v708_v30 = vrot.slane %v706_v17, 7  ;;  %v547_v40 = vadd.f32 %v4581_v52, %v546_v6  ;;  %v910_v43 = vshrl.u32 %v4675_v56, 16  ;;  %v914_v48 = vrot.slane %v912_v22, 1  ;;  %v4011_v22 = vld [vmem:[#allocation7 + $0x1b0] sm:$0xff]  }
 0x19c   : > { %3545 = vmatpush3.bf16.msra.mxu0 %v4003_v10  ;;  %v4697_v37 = vsel %vm860_vm3, %v903_v29, %v907_v11  ;;  %v917_v49 = vshll.u32 %v4691_v27, 16  ;;  %v715_v50 = vrot.slane %v713_v28, 7  ;;  %v716_v55 = vshll.u32 %v659_v1, 16 }
 0x19d   : > { %3546 = vmatprep.subr.bf16.mxu0 %v4006_v15  ;;  %v711_v41 = vor.u32 %v709_v19, %v708_v30  ;;  %v637_v57 = vmax.f32 %v555_v39, 0.0  ;;  %v635_v58 = vmax.f32 %v547_v40, 0.0  ;;  %v4713_v62 = vsel %vm4558_vm2, %v708_v30, 0  ;;  %v4012_v30 = vld [vmem:[#allocation7 + $0x1f8] sm:$0xff]  }
 0x19e   : > { %1817 = vmatmul.mubr.bf16.gmra.mrb[24].mxu1 %v4622_v53  ;;  %v915_v5 = vor.u32 %v914_v48, %v910_v43  ;;  %v919_v6 = vrot.slane %v917_v49, 1  ;;  %v1111_v10 = vrot.slane %v4660_v47, 1  ;;  %v1112_v11 = vrot.slane %v4647_v36, 1  ;;  %v4013_v40 = vld [vmem:[#allocation7 + $0x1b8] sm:$0xff]  }
 0x19f   : > { %1824 = vmatprep.mubr.bf16.mxu1 %v4697_v37  ;;  %1978 = vmatmul.mubr.bf16.gmra.mrb[24].mxu0 %v4694_v32  ;;  %v4709_v59 = vsel %vm4558_vm2, 0, %v711_v41  ;;  %v4715_v63 = vpack.c.bf16 %v637_v57, %v636_v34  ;;  %v660_v1 = vpack.c.bf16 %v635_v58, %v634_v44  ;;  %v718_v12 = vor.u32 %v716_v55, %v715_v50 }
 0x1a0   : > { %1985 = vmatprep.mubr.bf16.mxu0 %v4675_v56  ;;  %3547 = vmatpush3.bf16.msra.mxu0 %v4007_v35  ;;  %v924_v3 = vshll.u32 %v4709_v59, 16  ;;  %v922_v17 = vshrl.u32 %v4709_v59, 16  ;;  %v929_v20 = vshll.u32 %v4713_v62, 16  ;;  %v4724_v34 = vsel %vm860_vm3, %v915_v5, %v919_v6 }
 0x1a1   : > { %3548 = vmatprep.subr.bf16.mxu0 %v4008_v9  ;;  %v720_v15 = vshrl.u32 %v660_v1, 16  ;;  %v723_v29 = vshll.u32 %v660_v1, 16  ;;  %v4727_v36 = vsel %vm1101_vm4, %v1111_v10, %v1112_v11  ;;  %v4733_v35 = vsel %vm4558_vm2, 0, %v718_v12 }
 0x1a2   : > { %v926_v19 = vrot.slane %v924_v3, 1  ;;  %v931_v39 = vrot.slane %v929_v20, 1  ;;  %v1114_v41 = vrot.slane %v4675_v56, 1  ;;  %v1115_v43 = vrot.slane %v4691_v27, 1 }
 0x1a3   : > { %v722_v28 = vrot.slane %v720_v15, 7  ;;  %v4740_v48 = vsel %vm4558_vm2, %v715_v50, 0  ;;  %v727_v49 = vshrl.u32 %v4715_v63, 16  ;;  %v936_v55 = vshll.u32 %v4733_v35, 16 }
 0x1a4   : > { %3549 = vmatpush3.bf16.msra.mxu0 %v4009_v61  ;;  %v927_v44 = vor.u32 %v926_v19, %v922_v17  ;;  %v584_v58 = vadd.f32 %v4597_v26, %v4581_v52  ;;  %v576_v61 = vadd.f32 %v4581_v52, %v4601_v31  ;;  %v4752_v27 = vsel %vm1101_vm4, %v1114_v41, %v1115_v43 }
 0x1a5   : > { %3550 = vmatprep.subr.bf16.mxu0 %v4010_v4  ;;  %v725_v9 = vor.u32 %v723_v29, %v722_v28  ;;  %v941_v50 = vshll.u32 %v4740_v48, 16  ;;  %v734_v1 = vshrl.u32 %v4595_v25, 16  ;;  %v729_v4 = vrot.slane %v727_v49, 7 }
 0x1a6   : > { %1825 = vmatmul.mubr.bf16.gmra.mrb[28].mxu1 %v4660_v47  ;;  %v4745_v57 = vsel %vm860_vm3, %v927_v44, %v931_v39  ;;  %v730_v5 = vshll.u32 %v4715_v63, 16  ;;  %v934_v26 = vshrl.u32 %v4733_v35, 16  ;;  %v938_v31 = vrot.slane %v936_v55, 1 }
 0x1a7   : > { %1832 = vmatprep.mubr.bf16.mxu1 %v4724_v34  ;;  %1986 = vmatmul.mubr.bf16.gmra.mrb[28].mxu0 %v4727_v36  ;;  %v4758_v3 = vsel %vm4558_vm2, 0, %v725_v9  ;;  %v644_v6 = vmax.f32 %v584_v58, 0.0  ;;  %v642_v10 = vmax.f32 %v576_v61, 0.0  ;;  %v587_v11 = vadd.f32 %v4604_v23, %v4581_v52 }
 0x1a8   : > { %1993 = vmatprep.mubr.bf16.mxu0 %v4709_v59  ;;  %3551 = vmatpush3.bf16.msra.mxu0 %v4011_v22  ;;  %v579_v12 = vadd.f32 %v4581_v52, %v4607_v42  ;;  %v948_v63 = vshll.u32 %v4758_v3, 16  ;;  %v4773_v15 = vsel %vm4558_vm2, %v722_v28, 0  ;;  %v943_v17 = vrot.slane %v941_v50, 1 }
 0x1a9   : > { %3552 = vmatprep.subr.bf16.mxu0 %v4012_v30  ;;  %v645_v19 = vmax.f32 %v587_v11, 0.0  ;;  %v732_v22 = vor.u32 %v730_v5, %v729_v4  ;;  %v939_v29 = vor.u32 %v938_v31, %v934_v26  ;;  %v1117_v30 = vrot.slane %v4709_v59, 1 }
 0x1aa   : > { %v643_v20 = vmax.f32 %v579_v12, 0.0  ;;  %v1118_v23 = vrot.slane %v4713_v62, 1  ;;  %v736_v44 = vrot.slane %v734_v1, 7  ;;  %v737_v42 = vshll.u32 %v4595_v25, 16 }
 0x1ab   : > { %v4778_v39 = vpack.c.bf16 %v645_v19, %v644_v6  ;;  %v946_v9 = vshrl.u32 %v4758_v3, 16  ;;  %v950_v28 = vrot.slane %v948_v63, 1  ;;  %v953_v41 = vshll.u32 %v4773_v15, 16 }
 0x1ac   : > { %3553 = vmatpush3.bf16.msra.mxu0 %v4013_v40  ;;  %v4780_v40 = vpack.c.bf16 %v643_v20, %v642_v10  ;;  %v600_v43 = vadd.f32 %v4629_v2, %v4581_v52  ;;  %v4788_v49 = vsel %vm860_vm3, %v939_v29, %v943_v17  ;;  %v4791_v62 = vsel %vm1101_vm4, %v1117_v30, %v1118_v23 }
 0x1ad   : > { %v739_v25 = vor.u32 %v737_v42, %v736_v44  ;;  %v4797_v55 = vsel %vm4558_vm2, 0, %v732_v22  ;;  %v592_v2 = vadd.f32 %v4581_v52, %v4633_v8  ;;  %v951_v58 = vor.u32 %v950_v28, %v946_v9 }
 0x1ae   : > { %1833 = vmatmul.mubr.bf16.gmra.mrb[32].mxu1 %v4675_v56  ;;  %v955_v61 = vrot.slane %v953_v41, 1  ;;  %v648_v50 = vmax.f32 %v600_v43, 0.0  ;;  %v603_v1 = vadd.f32 %v4639_v14, %v4581_v52  ;;  %v1120_v5 = vrot.slane %v4733_v35, 1 }
 0x1af   : > { %1840 = vmatprep.mubr.bf16.mxu1 %v4745_v57  ;;  %1994 = vmatmul.mubr.bf16.gmra.mrb[32].mxu0 %v4752_v27  ;;  %v1121_v26 = vrot.slane %v4740_v48, 1  ;;  %v960_v31 = vshll.u32 %v4797_v55, 16  ;;  %v851_v10 = vsel %vm4558_vm2, %v729_v4, 0  ;;  %v741_v8 = vshrl.u32 %v4591_v18, 16 }
 0x1b0   : > { %2001 = vmatprep.mubr.bf16.mxu0 %v4733_v35  ;;  %v649_v6 = vmax.f32 %v603_v1, 0.0  ;;  %v646_v11 = vmax.f32 %v592_v2, 0.0  ;;  %v595_v12 = vadd.f32 %v4581_v52, %v4642_v24  ;;  %v4813_v63 = vsel %vm860_vm3, %v951_v58, %v955_v61 }
 0x1b1   : > { %v4817_v14 = vsel %vm4558_vm2, 0, %v739_v25  ;;  %v4823_v4 = vsel %vm1101_vm4, %v1120_v5, %v1121_v26  ;;  %v958_v19 = vshrl.u32 %v4797_v55, 16  ;;  %v962_v20 = vrot.slane %v960_v31, 1 }
 0x1b2   : > { %v4819_v48 = vpack.c.bf16 %v649_v6, %v648_v50  ;;  %v647_v17 = vmax.f32 %v595_v12, 0.0  ;;  %v965_v22 = vshll.u32 %v851_v10, 16  ;;  %v743_v24 = vrot.slane %v741_v8, 7 }
 0x1b3   : > { %v744_v29 = vshll.u32 %v4591_v18, 16  ;;  %v972_v30 = vshll.u32 %v4817_v14, 16  ;;  %v4834_v42 = vsel %vm4558_vm2, %v736_v44, 0  ;;  %v616_v9 = vadd.f32 %v4667_v60, %v4581_v52 }
 0x1b4   : > { %v4830_v23 = vpack.c.bf16 %v647_v17, %v646_v11  ;;  %v608_v18 = vadd.f32 %v4581_v52, %v4677_v0  ;;  %v748_v28 = vshrl.u32 %v4780_v40, 16  ;;  %v963_v41 = vor.u32 %v962_v20, %v958_v19 }
 0x1b5   : > { %v967_v43 = vrot.slane %v965_v22, 1  ;;  %v1123_v25 = vrot.slane %v4758_v3, 1  ;;  %v1124_v2 = vrot.slane %v4773_v15, 1  ;;  %v746_v58 = vor.u32 %v744_v29, %v743_v24 }
 0x1b6   : > { %1841 = vmatmul.mubr.bf16.gmra.mrb[36].mxu1 %v4709_v59  ;;  %v970_v44 = vshrl.u32 %v4817_v14, 16  ;;  %v974_v61 = vrot.slane %v972_v30, 1  ;;  %v977_v50 = vshll.u32 %v4834_v42, 16  ;;  %v652_v1 = vmax.f32 %v616_v9, 0.0 }
 0x1b7   : > { %1848 = vmatprep.mubr.bf16.mxu1 %v4788_v49  ;;  %2002 = vmatmul.mubr.bf16.gmra.mrb[36].mxu0 %v4791_v62  ;;  %v650_v5 = vmax.f32 %v608_v18, 0.0  ;;  %v619_v60 = vadd.f32 %v4681_v7, %v4581_v52  ;;  %v611_v0 = vadd.f32 %v4581_v52, %v4684_v13  ;;  %v750_v26 = vrot.slane %v748_v28, 7 }
 0x1b8   : > { %2009 = vmatprep.mubr.bf16.mxu0 %v4758_v3  ;;  %v751_v31 = vshll.u32 %v4780_v40, 16  ;;  %v4853_v15 = vsel %vm860_vm3, %v963_v41, %v967_v43  ;;  %v4856_v6 = vsel %vm1101_vm4, %v1123_v25, %v1124_v2  ;;  %v4862_v52 = vsel %vm4558_vm2, 0, %v746_v58 }
 0x1b9   : > { %v653_v8 = vmax.f32 %v619_v60, 0.0  ;;  %v651_v11 = vmax.f32 %v611_v0, 0.0  ;;  %v975_v7 = vor.u32 %v974_v61, %v970_v44  ;;  %v979_v13 = vrot.slane %v977_v50, 1 }
 0x1ba   : > { %v753_v17 = vor.u32 %v751_v31, %v750_v26  ;;  %v1126_v19 = vrot.slane %v4797_v55, 1  ;;  %v1127_v20 = vrot.slane %v851_v10, 1  ;;  %v984_v22 = vshll.u32 %v4862_v52, 16 }
 0x1bb   : > { %v4865_v40 = vpack.c.bf16 %v653_v8, %v652_v1  ;;  %v4867_v12 = vpack.c.bf16 %v651_v11, %v650_v5  ;;  %v853_v29 = vsel %vm4558_vm2, %v743_v24, 0  ;;  %v755_v30 = vshrl.u32 %v4778_v39, 16 }
 0x1bc   : > { %v4875_v9 = vsel %vm860_vm3, %v975_v7, %v979_v13  ;;  %v4879_v18 = vsel %vm4558_vm2, 0, %v753_v17  ;;  %v4883_v28 = vsel %vm1101_vm4, %v1126_v19, %v1127_v20  ;;  %v982_v10 = vshrl.u32 %v4862_v52, 16 }
 0x1bd   : > { %v986_v41 = vrot.slane %v984_v22, 1  ;;  %v989_v43 = vshll.u32 %v853_v29, 16  ;;  %v757_v25 = vrot.slane %v755_v30, 7  ;;  %v758_v24 = vshll.u32 %v4778_v39, 16 }
 0x1be   : > { %1849 = vmatmul.mubr.bf16.gmra.mrb[40].mxu1 %v4733_v35  ;;  %v996_v2 = vshll.u32 %v4879_v18, 16  ;;  %v854_v58 = vsel %vm4558_vm2, %v750_v26, 0  ;;  %v762_v44 = vshrl.u32 %v4830_v23, 16  ;;  %v1129_v1 = vrot.slane %v4817_v14, 1 }
 0x1bf   : > { %1856 = vmatprep.mubr.bf16.mxu1 %v4813_v63  ;;  %2010 = vmatmul.mubr.bf16.gmra.mrb[40].mxu0 %v4823_v4  ;;  %v987_v61 = vor.u32 %v986_v41, %v982_v10  ;;  %v991_v50 = vrot.slane %v989_v43, 1  ;;  %v1130_v5 = vrot.slane %v4834_v42, 1  ;;  %v760_v39 = vor.u32 %v758_v24, %v757_v25 }
 0x1c0   : > { %2017 = vmatprep.mubr.bf16.mxu0 %v4797_v55  ;;  %v994_v60 = vshrl.u32 %v4879_v18, 16  ;;  %v998_v0 = vrot.slane %v996_v2, 1  ;;  %v1001_v31 = vshll.u32 %v854_v58, 16  ;;  %v764_v8 = vrot.slane %v762_v44, 7  ;;  %v3218_v44 = vpop.f32.mrb[16].mxu1 }
 0x1c1   : > { %v765_v11 = vshll.u32 %v4830_v23, 16  ;;  %v4900_v26 = vsel %vm860_vm3, %v987_v61, %v991_v50  ;;  %v4903_v7 = vsel %vm1101_vm4, %v1129_v1, %v1130_v5  ;;  %v4909_v42 = vsel %vm4558_vm2, 0, %v760_v39  ;;  %v3219_v1 = vpop.f32.mrb[17].mxu1 }
 0x1c2   : > { %v999_v13 = vor.u32 %v998_v0, %v994_v60  ;;  %v1003_v23 = vrot.slane %v1001_v31, 1  ;;  %v855_v19 = vsel %vm4558_vm2, %v757_v25, 0  ;;  %v1132_v20 = vrot.slane %v4862_v52, 1  ;;  %v3221_v60 = vpop.f32.mrb[18].mxu1 }
 0x1c3   : > { %v767_v17 = vor.u32 %v765_v11, %v764_v8  ;;  %v1133_v22 = vrot.slane %v853_v29, 1  ;;  %v1008_v30 = vshll.u32 %v4909_v42, 16  ;;  %v769_v10 = vshrl.u32 %v4819_v48, 16 }
 0x1c4   : > { %v4918_v41 = vsel %vm860_vm3, %v999_v13, %v1003_v23  ;;  %v1013_v43 = vshll.u32 %v855_v19, 16  ;;  %v1006_v25 = vshrl.u32 %v4909_v42, 16  ;;  %v772_v50 = vshll.u32 %v4819_v48, 16  ;;  %v3222_v13 = vpop.f32.mrb[19].mxu1 }
 0x1c5   : > { %v4922_v24 = vsel %vm4558_vm2, 0, %v767_v17  ;;  %v4926_v2 = vsel %vm1101_vm4, %v1132_v20, %v1133_v22  ;;  %v1010_v29 = vrot.slane %v1008_v30, 1  ;;  %v771_v61 = vrot.slane %v769_v10, 7 }
 0x1c6   : > { %1857 = vmatmul.mubr.bf16.gmra.mrb[44].mxu1 %v4758_v3  ;;  %v1020_v5 = vshll.u32 %v4922_v24, 16  ;;  %v4934_v39 = vadd.f32 %v3219_v1, %v3218_v44  ;;  %v856_v0 = vsel %vm4558_vm2, %v764_v8, 0  ;;  %v1015_v31 = vrot.slane %v1013_v43, 1 }
 0x1c7   : > { %1864 = vmatprep.mubr.bf16.mxu1 %v4853_v15  ;;  %2018 = vmatmul.mubr.bf16.gmra.mrb[44].mxu0 %v4856_v6  ;;  %v776_v11 = vshrl.u32 %v4867_v12, 16  ;;  %v1011_v48 = vor.u32 %v1010_v29, %v1006_v25  ;;  %v1135_v23 = vrot.slane %v4879_v18, 1  ;;  %v1136_v17 = vrot.slane %v854_v58, 1 }
 0x1c8   : > { %2025 = vmatprep.mubr.bf16.mxu0 %v4817_v14  ;;  %v4940_v20 = vadd.f32 %v3222_v13, %v3221_v60  ;;  %v774_v22 = vor.u32 %v772_v50, %v771_v61  ;;  %v1018_v30 = vshrl.u32 %v4922_v24, 16  ;;  %v1022_v10 = vrot.slane %v1020_v5, 1 }
 0x1c9   : > { %v1025_v44 = vshll.u32 %v856_v0, 16  ;;  %v778_v1 = vrot.slane %v776_v11, 7  ;;  %v779_v51 = vshll.u32 %v4867_v12, 16  ;;  %v4946_v8 = vsel %vm860_vm3, %v1011_v48, %v1015_v31 }
 0x1ca   : > { %v4949_v43 = vsel %vm1101_vm4, %v1135_v23, %v1136_v17  ;;  %v4955_v58 = vsel %vm4558_vm2, 0, %v774_v22  ;;  %v1023_v25 = vor.u32 %v1022_v10, %v1018_v30  ;;  %v1138_v50 = vrot.slane %v4909_v42, 1 }
 0x1cb   : > { %v1027_v12 = vrot.slane %v1025_v44, 1  ;;  %v781_v29 = vor.u32 %v779_v51, %v778_v1  ;;  %v1139_v5 = vrot.slane %v855_v19, 1  ;;  %v1032_v60 = vshll.u32 %v4955_v58, 16 }
 0x1cc   : > { %v857_v31 = vsel %vm4558_vm2, %v771_v61, 0  ;;  %v1030_v51 = vshrl.u32 %v4955_v58, 16  ;;  %v858_v17 = vsel %vm4558_vm2, %v778_v1, 0  ;;  %v1141_v10 = vrot.slane %v4922_v24, 1 }
 0x1cd   : > { %v4963_v11 = vsel %vm860_vm3, %v1023_v25, %v1027_v12  ;;  %v4967_v13 = vsel %vm4558_vm2, 0, %v781_v29  ;;  %v4971_v48 = vsel %vm1101_vm4, %v1138_v50, %v1139_v5  ;;  %v1034_v19 = vrot.slane %v1032_v60, 1 }
 0x1ce   : > { %1865 = vmatmul.mubr.bf16.gmra.mrb[48].mxu1 %v4797_v55  ;;  %v1037_v23 = vshll.u32 %v857_v31, 16  ;;  %v1044_v61 = vshll.u32 %v4967_v13, 16  ;;  %v1142_v44 = vrot.slane %v856_v0, 1  ;;  %v783_v25 = vshrl.u32 %v4865_v40, 16 }
 0x1cf   : > { %1872 = vmatprep.mubr.bf16.mxu1 %v4875_v9  ;;  %2026 = vmatmul.mubr.bf16.gmra.mrb[48].mxu0 %v4883_v28  ;;  %v1035_v22 = vor.u32 %v1034_v19, %v1030_v51  ;;  %v1042_v12 = vshrl.u32 %v4967_v13, 16  ;;  %v1049_v50 = vshll.u32 %v858_v17, 16  ;;  %v786_v51 = vshll.u32 %v4865_v40, 16 }
 0x1d0   : > { %2033 = vmatprep.mubr.bf16.mxu0 %v4862_v52  ;;  %v1039_v30 = vrot.slane %v1037_v23, 1  ;;  %v1046_v29 = vrot.slane %v1044_v61, 1  ;;  %v4988_v60 = vsel %vm1101_vm4, %v1141_v10, %v1142_v44  ;;  %v4990_v1 = vrot.slane %v783_v25, 7 }
 0x1d1   : > { %v1051_v19 = vrot.slane %v1049_v50, 1  ;;  %v1144_v23 = vrot.slane %v4955_v58, 1  ;;  %v1145_v61 = vrot.slane %v857_v31, 1  ;;  %v1147_v31 = vrot.slane %v4967_v13, 1 }
 0x1d2   : > { %v4985_v5 = vsel %vm860_vm3, %v1035_v22, %v1039_v30  ;;  %v1047_v0 = vor.u32 %v1046_v29, %v1042_v12  ;;  %v788_v22 = vor.u32 %v786_v51, %v4990_v1  ;;  %v1148_v44 = vrot.slane %v858_v17, 1  ;;  %v4015_v12 = vld [vmem:[#allocation7 + $0x208] sm:$0xff]   ;;  %v4016_v17 = vld [vmem:[#allocation7 + $0x210] sm:$0xff]   ;;  %v4017_v29 = vld [vmem:[#allocation7 + $0x218] sm:$0xff]  }
 0x1d3   : > { %v5003_v40 = vsel %vm1101_vm4, %v1144_v23, %v1145_v61  ;;  %v4022_v51 = vld [vmem:[#allocation8] sm:$0xff]  }
 0x1d4   : > { %v4999_v30 = vsel %vm860_vm3, %v1047_v0, %v1051_v19  ;;  %v5009_v10 = vsel %vm4558_vm2, 0, %v788_v22  ;;  %v5015_v25 = vsel %vm1101_vm4, %v1147_v31, %v1148_v44  ;;  %3794 = vmatprep.subr.bf16.mxu0 %v4022_v51 }
 0x1d5   : > { %v1167_v16 = vshrl.u32 %v5009_v10, 16 }
 0x1d6   : > { %1873 = vmatmul.mubr.bf16.gmra.mrb[52].mxu1 %v4817_v14 }
 0x1d7   : > { %1880 = vmatprep.mubr.bf16.mxu1 %v4900_v26  ;;  %2034 = vmatmul.mubr.bf16.gmra.mrb[52].mxu0 %v4903_v7 }
 0x1d8   : > { %2041 = vmatprep.mubr.bf16.mxu0 %v4879_v18 }
 0x1de   : > { %1881 = vmatmul.mubr.bf16.gmra.mrb[56].mxu1 %v4862_v52 }
 0x1df   : > { %1888 = vmatprep.mubr.bf16.mxu1 %v4918_v41  ;;  %2042 = vmatmul.mubr.bf16.gmra.mrb[56].mxu0 %v4926_v2 }
 0x1e0   : > { %2049 = vmatprep.mubr.bf16.mxu0 %v4909_v42 }
 0x1e6   : > { %1889 = vmatmul.mubr.bf16.gmra.mrb[60].mxu1 %v4879_v18 }
 0x1e7   : > { %1896 = vmatprep.mubr.bf16.mxu1 %v4946_v8  ;;  %2050 = vmatmul.mubr.bf16.gmra.mrb[60].mxu0 %v4949_v43 }
 0x1e8   : > { %2057 = vmatprep.mubr.bf16.mxu0 %v4922_v24 }
 0x1ee   : > { %1897 = vmatmul.mubr.bf16.gmra.mrb[64].mxu1 %v4909_v42 }
 0x1ef   : > { %1904 = vmatprep.mubr.bf16.mxu1 %v4963_v11  ;;  %2058 = vmatmul.mubr.bf16.gmra.mrb[64].mxu0 %v4971_v48 }
 0x1f0   : > { %2065 = vmatprep.mubr.bf16.mxu0 %v4955_v58 }
 0x1f6   : > { %1905 = vmatmul.mubr.bf16.gmra.mrb[68].mxu1 %v4922_v24 }
 0x1f7   : > { %1912 = vmatprep.mubr.bf16.mxu1 %v4985_v5  ;;  %2066 = vmatmul.mubr.bf16.gmra.mrb[68].mxu0 %v4988_v60 }
 0x1f8   : > { %2073 = vmatprep.mubr.bf16.mxu0 %v4967_v13 }
 0x1fe   : > { %1913 = vmatmul.mubr.bf16.gmra.mrb[72].mxu1 %v4955_v58 }
 0x1ff   : > { %1920 = vmatprep.mubr.bf16.mxu1 %v4999_v30  ;;  %2074 = vmatmul.mubr.bf16.gmra.mrb[72].mxu0 %v5003_v40 }
 0x200   : > { %2081 = vmatprep.mubr.bf16.mxu0 %v5009_v10 }
 0x206   : > { %1921 = vmatmul.mubr.bf16.gmra.mrb[76].mxu1 %v4967_v13 }
 0x207   : > { %2082 = vmatmul.mubr.bf16.gmra.mrb[76].mxu0 %v5015_v25  ;;  %2122 = vmatprep.mubr.bf16.mxu1 %v4656_v45  ;;  %v4021_v45 = vld [vmem:[#allocation7 + $0x238] sm:$0xff]  }
 0x208   : > { %2283 = vmatprep.mubr.bf16.mxu0 %v4664_v54 }
 0x20e   : > { %2123 = vmatmul.mubr.bf16.vlgmr.msra.gmra.mrb[80].mxu1 %v4650_v38  ;;  %v4020_v38 = vld [vmem:[#allocation7 + $0x230] sm:$0xff]  }
 0x20f   : > { %3747 = vmatpush3.bf16.msra.mxu1 %v4613_v46  ;;  %2130 = vmatprep.mubr.bf16.mxu1 %v4694_v32  ;;  %v4018_v46 = vld [vmem:[#allocation7 + $0x220] sm:$0xff]  }
 0x210   : > { %2284 = vmatmul.mubr.bf16.vlgmr.msra.gmra.mrb[80].mxu0 %v4622_v53  ;;  %3748 = vmatprep.subr.bf16.mxu1 %v4015_v12  ;;  %v4019_v53 = vld [vmem:[#allocation7 + $0x228] sm:$0xff]  }
 0x211   : > { %2291 = vmatprep.mubr.bf16.mxu0 %v4697_v37  ;;  %3795 = vmatpush3.bf16.msra.mxu0 %v4022_v51 }
 0x213   : > { %3749 = vmatpush3.bf16.msra.mxu1 %v4015_v12 }
 0x214   : > { %3750 = vmatprep.subr.bf16.mxu1 %v4016_v17 }
 0x216   : > { %2131 = vmatmul.mubr.bf16.gmra.mrb[84].mxu1 %v4664_v54 }
 0x217   : > { %2138 = vmatprep.mubr.bf16.mxu1 %v4727_v36  ;;  %3751 = vmatpush3.bf16.msra.mxu1 %v4016_v17 }
 0x218   : > { %2292 = vmatmul.mubr.bf16.gmra.mrb[84].mxu0 %v4660_v47  ;;  %3752 = vmatprep.subr.bf16.mxu1 %v4017_v29  ;;  %v5065_v47 = vld [vmem:[%s5498_s4] ss:$0 sm:$0xff] }
 0x219   : > { %2299 = vmatprep.mubr.bf16.mxu0 %v4724_v34  ;;  %v1803_v54 = vadd.f32 %v4934_v39, %v5065_v47  ;;  %v1169_v39 = vshll.u32 %v5009_v10, 16 }
 0x21b   : > { %3753 = vmatpush3.bf16.msra.mxu1 %v4017_v29 }
 0x21c   : > { %3754 = vmatprep.subr.bf16.mxu1 %v4018_v46 }
 0x21e   : > { %2139 = vmatmul.mubr.bf16.gmra.mrb[88].mxu1 %v4697_v37 }
 0x21f   : > { %2146 = vmatprep.mubr.bf16.mxu1 %v4752_v27  ;;  %3755 = vmatpush3.bf16.msra.mxu1 %v4018_v46 }
 0x220   : > { %2300 = vmatmul.mubr.bf16.gmra.mrb[88].mxu0 %v4675_v56  ;;  %3756 = vmatprep.subr.bf16.mxu1 %v4019_v53 }
 0x221   : > { %2307 = vmatprep.mubr.bf16.mxu0 %v4745_v57 }
 0x223   : > { %3757 = vmatpush3.bf16.msra.mxu1 %v4019_v53 }
 0x224   : > { %3758 = vmatprep.subr.bf16.mxu1 %v4020_v38 }
 0x226   : > { %2147 = vmatmul.mubr.bf16.gmra.mrb[92].mxu1 %v4724_v34 }
 0x227   : > { %2154 = vmatprep.mubr.bf16.mxu1 %v4791_v62  ;;  %3759 = vmatpush3.bf16.msra.mxu1 %v4020_v38 }
 0x228   : > { %2308 = vmatmul.mubr.bf16.gmra.mrb[92].mxu0 %v4709_v59  ;;  %3760 = vmatprep.subr.bf16.mxu1 %v4021_v45 }
 0x229   : > { %2315 = vmatprep.mubr.bf16.mxu0 %v4788_v49 }
 0x22b   : > { %3761 = vmatpush3.bf16.msra.mxu1 %v4021_v45 }
 0x22e   : > { %2155 = vmatmul.mubr.bf16.gmra.mrb[96].mxu1 %v4745_v57  ;;  %v1806_v57 = vadd.f32 %v4940_v20, %v5065_v47  ;;  %v859_v20 = vsel %vm4558_vm2, %v4990_v1, 0  ;;  %v1171_v1 = vrot.slane %v1169_v39, 1 }
 0x22f   : > { %2162 = vmatprep.mubr.bf16.mxu1 %v4823_v4  ;;  %v1174_v61 = vshll.u32 %v859_v20, 16 }
 0x230   : > { %2316 = vmatmul.mubr.bf16.gmra.mrb[96].mxu0 %v4733_v35  ;;  %v1172_v45 = vor.u32 %v1171_v1, %v1167_v16 }
 0x231   : > { %2323 = vmatprep.mubr.bf16.mxu0 %v4813_v63 }
 0x236   : > { %2163 = vmatmul.mubr.bf16.gmra.mrb[100].mxu1 %v4788_v49 }
 0x237   : > { %2170 = vmatprep.mubr.bf16.mxu1 %v4856_v6 }
 0x238   : > { %2324 = vmatmul.mubr.bf16.gmra.mrb[100].mxu0 %v4758_v3 }
 0x239   : > { %2331 = vmatprep.mubr.bf16.mxu0 %v4853_v15 }
 0x23e   : > { %2171 = vmatmul.mubr.bf16.gmra.mrb[104].mxu1 %v4813_v63 }
 0x23f   : > { %2178 = vmatprep.mubr.bf16.mxu1 %v4883_v28 }
 0x240   : > { %2332 = vmatmul.mubr.bf16.gmra.mrb[104].mxu0 %v4797_v55 }
 0x241   : > { %2339 = vmatprep.mubr.bf16.mxu0 %v4875_v9 }
 0x246   : > { %2179 = vmatmul.mubr.bf16.gmra.mrb[108].mxu1 %v4853_v15 }
 0x247   : > { %2186 = vmatprep.mubr.bf16.mxu1 %v4903_v7 }
 0x248   : > { %2340 = vmatmul.mubr.bf16.gmra.mrb[108].mxu0 %v4817_v14 }
 0x249   : > { %2347 = vmatprep.mubr.bf16.mxu0 %v4900_v26 }
 0x24e   : > { %2187 = vmatmul.mubr.bf16.gmra.mrb[112].mxu1 %v4875_v9 }
 0x24f   : > { %2194 = vmatprep.mubr.bf16.mxu1 %v4926_v2 }
 0x250   : > { %2348 = vmatmul.mubr.bf16.gmra.mrb[112].mxu0 %v4862_v52 }
 0x251   : > { %2355 = vmatprep.mubr.bf16.mxu0 %v4918_v41 }
 0x256   : > { %2195 = vmatmul.mubr.bf16.gmra.mrb[116].mxu1 %v4900_v26 }
 0x257   : > { %2202 = vmatprep.mubr.bf16.mxu1 %v4949_v43 }
 0x258   : > { %2356 = vmatmul.mubr.bf16.gmra.mrb[116].mxu0 %v4879_v18 }
 0x259   : > { %2363 = vmatprep.mubr.bf16.mxu0 %v4946_v8 }
 0x25e   : > { %2203 = vmatmul.mubr.bf16.gmra.mrb[120].mxu1 %v4918_v41 }
 0x25f   : > { %2210 = vmatprep.mubr.bf16.mxu1 %v4971_v48 }
 0x260   : > { %2364 = vmatmul.mubr.bf16.gmra.mrb[120].mxu0 %v4909_v42 }
 0x261   : > { %2371 = vmatprep.mubr.bf16.mxu0 %v4963_v11 }
 0x262   : > { %v3330_v56 = vpop.f32.mrb[16].mxu0 }
 0x263   : > { %v3331_v37 = vpop.f32.mrb[17].mxu0 }
 0x264   : > { %v3332_v59 = vadd.f32 %v3331_v37, %v3330_v56  ;;  %v3333_v34 = vpop.f32.mrb[18].mxu0 }
 0x265   : > { %v3334_v35 = vpop.f32.mrb[19].mxu0 }
 0x266   : > { %v5074_v3 = vadd.f32 %v3332_v59, %v1803_v54  ;;  %v3335_v49 = vadd.f32 %v3334_v35, %v3333_v34  ;;  %2211 = vmatmul.mubr.bf16.gmra.mrb[124].mxu1 %v4946_v8 }
 0x267   : > { %2218 = vmatprep.mubr.bf16.mxu1 %v4988_v60 }
 0x268   : > { %v5078_v55 = vadd.f32 %v3335_v49, %v1806_v57  ;;  %2372 = vmatmul.mubr.bf16.gmra.mrb[124].mxu0 %v4922_v24 }
 0x269   : > { %2379 = vmatprep.mubr.bf16.mxu0 %v4985_v5  ;;  %v3224_v63 = vpop.f32.mrb[20].mxu1 }
 0x26a   : > { %v3225_v14 = vpop.f32.mrb[21].mxu1  ;;  %v3336_v15 = vpop.f32.mrb[20].mxu0 }
 0x26b   : > { %v3226_v52 = vadd.f32 %v3225_v14, %v3224_v63  ;;  %v3227_v9 = vpop.f32.mrb[22].mxu1  ;;  %v3337_v18 = vpop.f32.mrb[21].mxu0 }
 0x26c   : > { %v3338_v26 = vadd.f32 %v3337_v18, %v3336_v15  ;;  %v3228_v42 = vpop.f32.mrb[23].mxu1  ;;  %v3339_v41 = vpop.f32.mrb[22].mxu0 }
 0x26d   : > { %v1811_v8 = vadd.f32 %v3226_v52, %v5065_v47  ;;  %v3229_v24 = vadd.f32 %v3228_v42, %v3227_v9  ;;  %v3340_v50 = vpop.f32.mrb[23].mxu0  ;;  %v1181_v52 = vrot.slane %v5009_v10, 1  ;;  %v1182_v9 = vrot.slane %v859_v20, 1 }
 0x26e   : > { %v3341_v0 = vadd.f32 %v3340_v50, %v3339_v41  ;;  %2219 = vmatmul.mubr.bf16.gmra.mrb[128].mxu1 %v4963_v11  ;;  %v4023_v50 = vld [vmem:[#allocation8 + $0x8] sm:$0xff]  }
 0x26f   : > { %v5088_v19 = vadd.f32 %v3338_v26, %v1811_v8  ;;  %v1814_v23 = vadd.f32 %v3229_v24, %v5065_v47  ;;  %2226 = vmatprep.mubr.bf16.mxu1 %v5003_v40  ;;  %3796 = vmatprep.subr.bf16.mxu0 %v4023_v50 }
 0x270   : > { %2380 = vmatmul.mubr.bf16.gmra.mrb[128].mxu0 %v4955_v58  ;;  %v1176_v58 = vrot.slane %v1174_v61, 1 }
 0x271   : > { %v5094_v22 = vadd.f32 %v3341_v0, %v1814_v23  ;;  %2387 = vmatprep.mubr.bf16.mxu0 %v4999_v30  ;;  %v3230_v31 = vpop.f32.mrb[24].mxu1  ;;  %v5111_v0 = vsel %vm1101_vm4, %v1181_v52, %v1182_v9  ;;  %3797 = vmatpush3.bf16.msra.mxu0 %v4023_v50 }
 0x272   : > { %v3231_v11 = vpop.f32.mrb[25].mxu1  ;;  %v3342_v44 = vpop.f32.mrb[24].mxu0  ;;  %v1177_v57 = vsel %vm860_vm3, %v1172_v45, %v1176_v58 }
 0x273   : > { %v3232_v12 = vadd.f32 %v3231_v11, %v3230_v31  ;;  %v3233_v17 = vpop.f32.mrb[26].mxu1  ;;  %v3343_v29 = vpop.f32.mrb[25].mxu0 }
 0x274   : > { %v3344_v46 = vadd.f32 %v3343_v29, %v3342_v44  ;;  %v3234_v53 = vpop.f32.mrb[27].mxu1  ;;  %v3345_v38 = vpop.f32.mrb[26].mxu0 }
 0x275   : > { %v1819_v54 = vadd.f32 %v3232_v12, %v5065_v47  ;;  %v3235_v56 = vadd.f32 %v3234_v53, %v3233_v17  ;;  %v3346_v37 = vpop.f32.mrb[27].mxu0 }
 0x276   : > { %v3347_v59 = vadd.f32 %v3346_v37, %v3345_v38  ;;  %2227 = vmatmul.mubr.bf16.gmra.mrb[132].mxu1 %v4985_v5 }
 0x277   : > { %v5099_v34 = vadd.f32 %v3344_v46, %v1819_v54  ;;  %v1822_v35 = vadd.f32 %v3235_v56, %v5065_v47  ;;  %2234 = vmatprep.mubr.bf16.mxu1 %v5015_v25 }
 0x278   : > { %2388 = vmatmul.mubr.bf16.gmra.mrb[132].mxu0 %v4967_v13 }
 0x279   : > { %v5105_v49 = vadd.f32 %v3347_v59, %v1822_v35  ;;  %2395 = vmatprep.mubr.bf16.mxu0 %v1177_v57  ;;  %v3236_v63 = vpop.f32.mrb[28].mxu1 }
 0x27a   : > { %v3237_v14 = vpop.f32.mrb[29].mxu1  ;;  %v3348_v15 = vpop.f32.mrb[28].mxu0 }
 0x27b   : > { %v3238_v5 = vadd.f32 %v3237_v14, %v3236_v63  ;;  %v3239_v18 = vpop.f32.mrb[30].mxu1  ;;  %v3349_v26 = vpop.f32.mrb[29].mxu0 }
 0x27c   : > { %v3350_v42 = vadd.f32 %v3349_v26, %v3348_v15  ;;  %v3240_v41 = vpop.f32.mrb[31].mxu1  ;;  %v3351_v39 = vpop.f32.mrb[30].mxu0 }
 0x27d   : > { %v1827_v8 = vadd.f32 %v3238_v5, %v5065_v47  ;;  %v3241_v13 = vadd.f32 %v3240_v41, %v3239_v18  ;;  %v3352_v24 = vpop.f32.mrb[31].mxu0  ;;  %v4024_v18 = vld [vmem:[#allocation8 + $0x10] sm:$0xff]  }
 0x27e   : > { %v3353_v51 = vadd.f32 %v3352_v24, %v3351_v39  ;;  %2235 = vmatmul.mubr.bf16.gmra.mrb[136].mxu1 %v4999_v30  ;;  %3798 = vmatprep.subr.bf16.mxu0 %v4024_v18 }
 0x27f   : > { %v5113_v23 = vadd.f32 %v3350_v42, %v1827_v8  ;;  %v1830_v20 = vadd.f32 %v3241_v13, %v5065_v47  ;;  %2242 = vmatprep.mubr.bf16.mxu1 %v5111_v0  ;;  %3799 = vmatpush3.bf16.msra.mxu0 %v4024_v18 }
 0x280   : > { %2396 = vmatmul.mubr.bf16.gmra.mrb[136].mxu0 %v5009_v10 }
 0x281   : > { %v5118_v16 = vadd.f32 %v3353_v51, %v1830_v20  ;;  %v3242_v1 = vpop.f32.mrb[32].mxu1  ;;  %2403 = vmatprep.mubr.bf16.mxu0 %v4574_v33 }
 0x282   : > { %v3243_v61 = vpop.f32.mrb[33].mxu1  ;;  %v3354_v30 = vpop.f32.mrb[32].mxu0 }
 0x283   : > { %v3244_v31 = vadd.f32 %v3243_v61, %v3242_v1  ;;  %v3245_v11 = vpop.f32.mrb[34].mxu1  ;;  %v3355_v44 = vpop.f32.mrb[33].mxu0 }
 0x284   : > { %v3356_v12 = vadd.f32 %v3355_v44, %v3354_v30  ;;  %v3246_v17 = vpop.f32.mrb[35].mxu1  ;;  %v3357_v29 = vpop.f32.mrb[34].mxu0 }
 0x285   : > { %v1835_v46 = vadd.f32 %v3244_v31, %v5065_v47  ;;  %v3247_v53 = vadd.f32 %v3246_v17, %v3245_v11  ;;  %v3358_v38 = vpop.f32.mrb[35].mxu0 }
 0x286   : > { %v3359_v45 = vadd.f32 %v3358_v38, %v3357_v29  ;;  %2243 = vmatmul.mubr.bf16.gmra.mrb[140].mxu1 %v1177_v57 }
 0x287   : > { %v5122_v10 = vadd.f32 %v3356_v12, %v1835_v46  ;;  %v1838_v58 = vadd.f32 %v3247_v53, %v5065_v47  ;;  %3762 = vmatprep.mubr.bf16.mxu1 %v4694_v32 }
 0x288   : > { %2404 = vmatmul.mubr.bf16.gmra.mrb[140].mxu0 %v4564_v21 }
 0x289   : > { %v5127_v33 = vadd.f32 %v3359_v45, %v1838_v58  ;;  %v3248_v54 = vpop.f32.mrb[36].mxu1 }
 0x28a   : > { %v3249_v56 = vpop.f32.mrb[37].mxu1  ;;  %v3360_v37 = vpop.f32.mrb[36].mxu0 }
 0x28b   : > { %v3250_v59 = vadd.f32 %v3249_v56, %v3248_v54  ;;  %v3251_v35 = vpop.f32.mrb[38].mxu1  ;;  %v3361_v63 = vpop.f32.mrb[37].mxu0 }
 0x28c   : > { %v3362_v14 = vadd.f32 %v3361_v63, %v3360_v37  ;;  %v3252_v15 = vpop.f32.mrb[39].mxu1  ;;  %v3363_v52 = vpop.f32.mrb[38].mxu0 }
 0x28d   : > { %v1843_v57 = vadd.f32 %v3250_v59, %v5065_v47  ;;  %v3253_v9 = vadd.f32 %v3252_v15, %v3251_v35  ;;  %v3364_v5 = vpop.f32.mrb[39].mxu0  ;;  %v4025_v59 = vld [vmem:[#allocation8 + $0x18] sm:$0xff]  }
 0x28e   : > { %v3365_v26 = vadd.f32 %v3364_v5, %v3363_v52  ;;  %3763 = vmatmul.mubr.bf16.vlgmr.msra.gmra.mrb[144].mxu1 %v4727_v36  ;;  %3800 = vmatprep.subr.bf16.mxu0 %v4025_v59 }
 0x28f   : > { %v5131_v21 = vadd.f32 %v3362_v14, %v1843_v57  ;;  %v1846_v32 = vadd.f32 %v3253_v9, %v5065_v47  ;;  %3766 = vmatprep.mubr.bf16.mxu1 %v4752_v27  ;;  %3801 = vmatpush3.bf16.msra.mxu0 %v4025_v59 }
 0x291   : > { %v5135_v42 = vadd.f32 %v3365_v26, %v1846_v32  ;;  %v3254_v41 = vpop.f32.mrb[40].mxu1 }
 0x292   : > { %v3255_v39 = vpop.f32.mrb[41].mxu1  ;;  %v3366_v8 = vpop.f32.mrb[40].mxu0 }
 0x293   : > { %v3256_v13 = vadd.f32 %v3255_v39, %v3254_v41  ;;  %v3257_v24 = vpop.f32.mrb[42].mxu1  ;;  %v3367_v50 = vpop.f32.mrb[41].mxu0 }
 0x294   : > { %v3368_v51 = vadd.f32 %v3367_v50, %v3366_v8  ;;  %v3258_v20 = vpop.f32.mrb[43].mxu1  ;;  %v3369_v1 = vpop.f32.mrb[42].mxu0 }
 0x295   : > { %v1851_v36 = vadd.f32 %v3256_v13, %v5065_v47  ;;  %v3259_v61 = vadd.f32 %v3258_v20, %v3257_v24  ;;  %v3370_v30 = vpop.f32.mrb[43].mxu0 }
 0x296   : > { %v3371_v31 = vadd.f32 %v3370_v30, %v3369_v1  ;;  %3767 = vmatmul.mubr.bf16.gmra.mrb[148].mxu1 %v4791_v62 }
 0x297   : > { %v5139_v27 = vadd.f32 %v3368_v51, %v1851_v36  ;;  %v1854_v11 = vadd.f32 %v3259_v61, %v5065_v47  ;;  %3770 = vmatprep.mubr.bf16.mxu1 %v4823_v4 }
 0x299   : > { %v5143_v44 = vadd.f32 %v3371_v31, %v1854_v11  ;;  %v3260_v12 = vpop.f32.mrb[44].mxu1 }
 0x29a   : > { %v3261_v17 = vpop.f32.mrb[45].mxu1  ;;  %v3372_v29 = vpop.f32.mrb[44].mxu0 }
 0x29b   : > { %v3262_v46 = vadd.f32 %v3261_v17, %v3260_v12  ;;  %v3263_v53 = vpop.f32.mrb[46].mxu1  ;;  %v3373_v38 = vpop.f32.mrb[45].mxu0 }
 0x29c   : > { %v3374_v45 = vadd.f32 %v3373_v38, %v3372_v29  ;;  %v3264_v58 = vpop.f32.mrb[47].mxu1  ;;  %v3375_v54 = vpop.f32.mrb[46].mxu0 }
 0x29d   : > { %v1859_v56 = vadd.f32 %v3262_v46, %v5065_v47  ;;  %v3265_v62 = vadd.f32 %v3264_v58, %v3263_v53  ;;  %v3376_v37 = vpop.f32.mrb[47].mxu0  ;;  %v4026_v46 = vld [vmem:[#allocation8 + $0x20] sm:$0xff]  }
 0x29e   : > { %v3377_v35 = vadd.f32 %v3376_v37, %v3375_v54  ;;  %3771 = vmatmul.mubr.bf16.gmra.mrb[152].mxu1 %v4856_v6  ;;  %3802 = vmatprep.subr.bf16.mxu0 %v4026_v46 }
 0x29f   : > { %v5147_v4 = vadd.f32 %v3374_v45, %v1859_v56  ;;  %v1862_v63 = vadd.f32 %v3265_v62, %v5065_v47  ;;  %3774 = vmatprep.mubr.bf16.mxu1 %v4883_v28  ;;  %3803 = vmatpush3.bf16.msra.mxu0 %v4026_v46 }
 0x2a1   : > { %v5151_v14 = vadd.f32 %v3377_v35, %v1862_v63  ;;  %v3266_v15 = vpop.f32.mrb[48].mxu1 }
 0x2a2   : > { %v3267_v52 = vpop.f32.mrb[49].mxu1  ;;  %v3378_v57 = vpop.f32.mrb[48].mxu0 }
 0x2a3   : > { %v3268_v9 = vadd.f32 %v3267_v52, %v3266_v15  ;;  %v3269_v5 = vpop.f32.mrb[50].mxu1  ;;  %v3379_v18 = vpop.f32.mrb[49].mxu0 }
 0x2a4   : > { %v3380_v26 = vadd.f32 %v3379_v18, %v3378_v57  ;;  %v3270_v32 = vpop.f32.mrb[51].mxu1  ;;  %v3381_v41 = vpop.f32.mrb[50].mxu0 }
 0x2a5   : > { %v1867_v6 = vadd.f32 %v3268_v9, %v5065_v47  ;;  %v3271_v39 = vadd.f32 %v3270_v32, %v3269_v5  ;;  %v3382_v8 = vpop.f32.mrb[51].mxu0 }
 0x2a6   : > { %v3383_v13 = vadd.f32 %v3382_v8, %v3381_v41  ;;  %3775 = vmatmul.mubr.bf16.gmra.mrb[156].mxu1 %v4903_v7 }
 0x2a7   : > { %v5155_v28 = vadd.f32 %v3380_v26, %v1867_v6  ;;  %v1870_v24 = vadd.f32 %v3271_v39, %v5065_v47  ;;  %3778 = vmatprep.mubr.bf16.mxu1 %v4926_v2 }
 0x2a9   : > { %v5159_v50 = vadd.f32 %v3383_v13, %v1870_v24  ;;  %v3272_v51 = vpop.f32.mrb[52].mxu1 }
 0x2aa   : > { %v3273_v20 = vpop.f32.mrb[53].mxu1  ;;  %v3384_v1 = vpop.f32.mrb[52].mxu0 }
 0x2ab   : > { %v3274_v36 = vadd.f32 %v3273_v20, %v3272_v51  ;;  %v3275_v61 = vpop.f32.mrb[54].mxu1  ;;  %v3385_v30 = vpop.f32.mrb[53].mxu0 }
 0x2ac   : > { %v3386_v31 = vadd.f32 %v3385_v30, %v3384_v1  ;;  %v3276_v11 = vpop.f32.mrb[55].mxu1  ;;  %v3387_v12 = vpop.f32.mrb[54].mxu0 }
 0x2ad   : > { %v1875_v17 = vadd.f32 %v3274_v36, %v5065_v47  ;;  %v3277_v7 = vadd.f32 %v3276_v11, %v3275_v61  ;;  %v3388_v29 = vpop.f32.mrb[55].mxu0  ;;  %v4027_v36 = vld [vmem:[#allocation8 + $0x28] sm:$0xff]  }
 0x2ae   : > { %v3389_v53 = vadd.f32 %v3388_v29, %v3387_v12  ;;  %3779 = vmatmul.mubr.bf16.gmra.mrb[160].mxu1 %v4949_v43  ;;  %3804 = vmatprep.subr.bf16.mxu0 %v4027_v36 }
 0x2af   : > { %v5163_v2 = vadd.f32 %v3386_v31, %v1875_v17  ;;  %v1878_v38 = vadd.f32 %v3277_v7, %v5065_v47  ;;  %3782 = vmatprep.mubr.bf16.mxu1 %v4971_v48  ;;  %3805 = vmatpush3.bf16.msra.mxu0 %v4027_v36 }
 0x2b1   : > { %v5167_v45 = vadd.f32 %v3389_v53, %v1878_v38  ;;  %v3278_v58 = vpop.f32.mrb[56].mxu1 }
 0x2b2   : > { %v3279_v54 = vpop.f32.mrb[57].mxu1  ;;  %v3390_v56 = vpop.f32.mrb[56].mxu0 }
 0x2b3   : > { %v3280_v62 = vadd.f32 %v3279_v54, %v3278_v58  ;;  %v3281_v37 = vpop.f32.mrb[58].mxu1  ;;  %v3391_v59 = vpop.f32.mrb[57].mxu0 }
 0x2b4   : > { %v3392_v35 = vadd.f32 %v3391_v59, %v3390_v56  ;;  %v3282_v63 = vpop.f32.mrb[59].mxu1  ;;  %v3393_v15 = vpop.f32.mrb[58].mxu0 }
 0x2b5   : > { %v1883_v43 = vadd.f32 %v3280_v62, %v5065_v47  ;;  %v3283_v52 = vadd.f32 %v3282_v63, %v3281_v37  ;;  %v3394_v57 = vpop.f32.mrb[59].mxu0  ;;  %v5525_v37 = vld [vmem:[#allocation16_spill] sm:$0xff] }
 0x2b6   : > { %v3395_v9 = vadd.f32 %v3394_v57, %v3393_v15  ;;  %3783 = vmatmul.mubr.bf16.gmra.mrb[164].mxu1 %v4988_v60 }
 0x2b7   : > { %v5171_v48 = vadd.f32 %v3392_v35, %v1883_v43  ;;  %v1886_v5 = vadd.f32 %v3283_v52, %v5065_v47  ;;  %3786 = vmatprep.mubr.bf16.mxu1 %v5003_v40 }
 0x2b9   : > { %v5175_v18 = vadd.f32 %v3395_v9, %v1886_v5  ;;  %v3284_v26 = vpop.f32.mrb[60].mxu1 }
 0x2ba   : > { %v3285_v32 = vpop.f32.mrb[61].mxu1  ;;  %v3396_v41 = vpop.f32.mrb[60].mxu0 }
 0x2bb   : > { %v3286_v6 = vadd.f32 %v3285_v32, %v3284_v26  ;;  %v3287_v39 = vpop.f32.mrb[62].mxu1  ;;  %v3397_v8 = vpop.f32.mrb[61].mxu0 }
 0x2bc   : > { %v3398_v13 = vadd.f32 %v3397_v8, %v3396_v41  ;;  %v3288_v24 = vpop.f32.mrb[63].mxu1  ;;  %v3399_v51 = vpop.f32.mrb[62].mxu0  ;;  %v4028_v8 = vld [vmem:[#allocation8 + $0x30] sm:$0xff]  }
 0x2bd   : > { %v1891_v20 = vadd.f32 %v3286_v6, %v5065_v47  ;;  %v3289_v60 = vadd.f32 %v3288_v24, %v3287_v39  ;;  %v3400_v1 = vpop.f32.mrb[63].mxu0  ;;  %3806 = vmatprep.subr.bf16.mxu0 %v4028_v8 }
 0x2be   : > { %v3401_v61 = vadd.f32 %v3400_v1, %v3399_v51  ;;  %3787 = vmatmul.mubr.bf16.gmra.mrb[168].mxu1 %v5015_v25  ;;  %3807 = vmatpush3.bf16.msra.mxu0 %v4028_v8 }
 0x2bf   : > { %v5179_v40 = vadd.f32 %v3398_v13, %v1891_v20  ;;  %v1894_v30 = vadd.f32 %v3289_v60, %v5065_v47  ;;  %3790 = vmatprep.mubr.bf16.mxu1 %v5111_v0 }
 0x2c1   : > { %v5183_v31 = vadd.f32 %v3401_v61, %v1894_v30  ;;  %v3290_v11 = vpop.f32.mrb[64].mxu1 }
 0x2c2   : > { %v3291_v12 = vpop.f32.mrb[65].mxu1  ;;  %v3402_v17 = vpop.f32.mrb[64].mxu0 }
 0x2c3   : > { %v3292_v7 = vadd.f32 %v3291_v12, %v3290_v11  ;;  %v3293_v29 = vpop.f32.mrb[66].mxu1  ;;  %v3403_v46 = vpop.f32.mrb[65].mxu0 }
 0x2c4   : > { %v3404_v53 = vadd.f32 %v3403_v46, %v3402_v17  ;;  %v3294_v38 = vpop.f32.mrb[67].mxu1  ;;  %v3405_v58 = vpop.f32.mrb[66].mxu0 }
 0x2c5   : > { %v1899_v25 = vadd.f32 %v3292_v7, %v5065_v47  ;;  %v3295_v54 = vadd.f32 %v3294_v38, %v3293_v29  ;;  %v3406_v56 = vpop.f32.mrb[67].mxu0 }
 0x2c6   : > { %v3407_v62 = vadd.f32 %v3406_v56, %v3405_v58  ;;  %3791 = vmatmul.mubr.bf16.gmra.mrb[172].mxu1 %v5525_v37 }
 0x2c7   : > { %v5187_v0 = vadd.f32 %v3404_v53, %v1899_v25  ;;  %v1902_v59 = vadd.f32 %v3295_v54, %v5065_v47 }
 0x2c9   : > { %v5190_v35 = vadd.f32 %v3407_v62, %v1902_v59  ;;  %v3296_v63 = vpop.f32.mrb[68].mxu1 }
 0x2ca   : > { %v3297_v15 = vpop.f32.mrb[69].mxu1  ;;  %v3408_v43 = vpop.f32.mrb[68].mxu0 }
 0x2cb   : > { %v3298_v52 = vadd.f32 %v3297_v15, %v3296_v63  ;;  %v3299_v57 = vpop.f32.mrb[70].mxu1  ;;  %v3409_v9 = vpop.f32.mrb[69].mxu0 }
 0x2cc   : > { %v3410_v5 = vadd.f32 %v3409_v9, %v3408_v43  ;;  %v3300_v26 = vpop.f32.mrb[71].mxu1  ;;  %v3411_v32 = vpop.f32.mrb[70].mxu0 }
 0x2cd   : > { %v1907_v41 = vadd.f32 %v3298_v52, %v5065_v47  ;;  %v3301_v6 = vadd.f32 %v3300_v26, %v3299_v57  ;;  %v3412_v39 = vpop.f32.mrb[71].mxu0 }
 0x2ce   : > { %v3413_v13 = vadd.f32 %v3412_v39, %v3411_v32  ;;  %v4029_v32 = vld [vmem:[#allocation8 + $0x38] sm:$0xff]  }
 0x2cf   : > { %v5193_v24 = vadd.f32 %v3410_v5, %v1907_v41  ;;  %v1910_v51 = vadd.f32 %v3301_v6, %v5065_v47  ;;  %3808 = vmatprep.subr.bf16.mxu0 %v4029_v32 }
 0x2d0   : > { %3809 = vmatpush3.bf16.msra.mxu0 %v4029_v32 }
 0x2d1   : > { %v5196_v20 = vadd.f32 %v3413_v13, %v1910_v51  ;;  %v3302_v60 = vpop.f32.mrb[72].mxu1 }
 0x2d2   : > { %v3303_v1 = vpop.f32.mrb[73].mxu1  ;;  %v3414_v36 = vpop.f32.mrb[72].mxu0 }
 0x2d3   : > { %v3304_v61 = vadd.f32 %v3303_v1, %v3302_v60  ;;  %v3305_v30 = vpop.f32.mrb[74].mxu1  ;;  %v3415_v11 = vpop.f32.mrb[73].mxu0 }
 0x2d4   : > { %v3416_v12 = vadd.f32 %v3415_v11, %v3414_v36  ;;  %v3306_v17 = vpop.f32.mrb[75].mxu1  ;;  %v3417_v7 = vpop.f32.mrb[74].mxu0 }
 0x2d5   : > { %v1915_v29 = vadd.f32 %v3304_v61, %v5065_v47  ;;  %v3307_v46 = vadd.f32 %v3306_v17, %v3305_v30  ;;  %v3418_v53 = vpop.f32.mrb[75].mxu0 }
 0x2d6   : > { %v3419_v38 = vadd.f32 %v3418_v53, %v3417_v7 }
 0x2d7   : > { %v5199_v58 = vadd.f32 %v3416_v12, %v1915_v29  ;;  %v1918_v25 = vadd.f32 %v3307_v46, %v5065_v47 }
 0x2d9   : > { %v5202_v54 = vadd.f32 %v3419_v38, %v1918_v25  ;;  %v3308_v56 = vpop.f32.mrb[76].mxu1 }
 0x2da   : > { %v3309_v62 = vpop.f32.mrb[77].mxu1  ;;  %v3420_v37 = vpop.f32.mrb[76].mxu0 }
 0x2db   : > { %v3310_v59 = vadd.f32 %v3309_v62, %v3308_v56  ;;  %v3311_v63 = vpop.f32.mrb[78].mxu1  ;;  %v3421_v15 = vpop.f32.mrb[77].mxu0 }
 0x2dc   : > { %v3422_v43 = vadd.f32 %v3421_v15, %v3420_v37  ;;  %v3312_v52 = vpop.f32.mrb[79].mxu1  ;;  %v3423_v57 = vpop.f32.mrb[78].mxu0 }
 0x2dd   : > { %v1923_v9 = vadd.f32 %v3310_v59, %v5065_v47  ;;  %v3313_v5 = vadd.f32 %v3312_v52, %v3311_v63  ;;  %v3424_v26 = vpop.f32.mrb[79].mxu0 }
 0x2de   : > { %v3425_v41 = vadd.f32 %v3424_v26, %v3423_v57 }
 0x2df   : > { %v5205_v6 = vadd.f32 %v3422_v43, %v1923_v9  ;;  %v1926_v39 = vadd.f32 %v3313_v5, %v5065_v47 }
 0x2e1   : > { %v5208_v8 = vadd.f32 %v3425_v41, %v1926_v39  ;;  %v3442_v13 = vpop.f32.mrb[80].mxu1 }
 0x2e2   : > { %v3443_v51 = vpop.f32.mrb[81].mxu1 }
 0x2e3   : > { %v3444_v60 = vadd.f32 %v3443_v51, %v3442_v13  ;;  %v3554_v1 = vpop.f32.mrb[80].mxu0  ;;  %v3445_v36 = vpop.f32.mrb[82].mxu1 }
 0x2e4   : > { %v3555_v61 = vpop.f32.mrb[81].mxu0  ;;  %v3446_v30 = vpop.f32.mrb[83].mxu1 }
 0x2e5   : > { %v2125_v11 = vadd.f32 %v3444_v60, %v5074_v3  ;;  %v3556_v12 = vadd.f32 %v3555_v61, %v3554_v1  ;;  %v3447_v17 = vadd.f32 %v3446_v30, %v3445_v36  ;;  %v3557_v7 = vpop.f32.mrb[82].mxu0 }
 0x2e6   : > { %v3558_v29 = vpop.f32.mrb[83].mxu0 }
 0x2e7   : > { %v2128_v46 = vadd.f32 %v3447_v17, %v5078_v55  ;;  %v3559_v47 = vadd.f32 %v3558_v29, %v3557_v7  ;;  %v5212_v53 = vadd.f32 %v3556_v12, %v2125_v11 }
 0x2e9   : > { %v3448_v38 = vpop.f32.mrb[84].mxu1  ;;  %v5214_v25 = vadd.f32 %v3559_v47, %v2128_v46 }
 0x2ea   : > { %v3449_v56 = vpop.f32.mrb[85].mxu1 }
 0x2eb   : > { %v3450_v62 = vadd.f32 %v3449_v56, %v3448_v38  ;;  %v3560_v37 = vpop.f32.mrb[84].mxu0  ;;  %v3451_v59 = vpop.f32.mrb[86].mxu1 }
 0x2ec   : > { %v3561_v63 = vpop.f32.mrb[85].mxu0  ;;  %v3452_v15 = vpop.f32.mrb[87].mxu1 }
 0x2ed   : > { %v2133_v3 = vadd.f32 %v3450_v62, %v5088_v19  ;;  %v3562_v43 = vadd.f32 %v3561_v63, %v3560_v37  ;;  %v3453_v52 = vadd.f32 %v3452_v15, %v3451_v59  ;;  %v3563_v57 = vpop.f32.mrb[86].mxu0 }
 0x2ee   : > { %v3564_v9 = vpop.f32.mrb[87].mxu0 }
 0x2ef   : > { %v2136_v55 = vadd.f32 %v3453_v52, %v5094_v22  ;;  %v3565_v5 = vadd.f32 %v3564_v9, %v3563_v57  ;;  %v5218_v26 = vadd.f32 %v3562_v43, %v2133_v3 }
 0x2f1   : > { %v3454_v32 = vpop.f32.mrb[88].mxu1  ;;  %v5220_v41 = vadd.f32 %v3565_v5, %v2136_v55 }
 0x2f2   : > { %v3455_v39 = vpop.f32.mrb[89].mxu1 }
 0x2f3   : > { %v3456_v13 = vadd.f32 %v3455_v39, %v3454_v32  ;;  %v3566_v51 = vpop.f32.mrb[88].mxu0  ;;  %v3457_v60 = vpop.f32.mrb[90].mxu1 }
 0x2f4   : > { %v3567_v1 = vpop.f32.mrb[89].mxu0  ;;  %v3458_v36 = vpop.f32.mrb[91].mxu1 }
 0x2f5   : > { %v2141_v19 = vadd.f32 %v3456_v13, %v5099_v34  ;;  %v3568_v61 = vadd.f32 %v3567_v1, %v3566_v51  ;;  %v3459_v30 = vadd.f32 %v3458_v36, %v3457_v60  ;;  %v3569_v11 = vpop.f32.mrb[90].mxu0 }
 0x2f6   : > { %v3570_v12 = vpop.f32.mrb[91].mxu0 }
 0x2f7   : > { %v2144_v22 = vadd.f32 %v3459_v30, %v5105_v49  ;;  %v3571_v17 = vadd.f32 %v3570_v12, %v3569_v11  ;;  %v5224_v7 = vadd.f32 %v3568_v61, %v2141_v19 }
 0x2f9   : > { %v3460_v29 = vpop.f32.mrb[92].mxu1  ;;  %v5226_v46 = vadd.f32 %v3571_v17, %v2144_v22 }
 0x2fa   : > { %v3461_v47 = vpop.f32.mrb[93].mxu1 }
 0x2fb   : > { %v3462_v38 = vadd.f32 %v3461_v47, %v3460_v29  ;;  %v3572_v56 = vpop.f32.mrb[92].mxu0  ;;  %v3463_v62 = vpop.f32.mrb[94].mxu1 }
 0x2fc   : > { %v3573_v37 = vpop.f32.mrb[93].mxu0  ;;  %v3464_v59 = vpop.f32.mrb[95].mxu1 }
 0x2fd   : > { %v2149_v34 = vadd.f32 %v3462_v38, %v5113_v23  ;;  %v3574_v63 = vadd.f32 %v3573_v37, %v3572_v56  ;;  %v3465_v15 = vadd.f32 %v3464_v59, %v3463_v62  ;;  %v3575_v3 = vpop.f32.mrb[94].mxu0 }
 0x2fe   : > { %v3576_v43 = vpop.f32.mrb[95].mxu0 }
 0x2ff   : > { %v2152_v49 = vadd.f32 %v3465_v15, %v5118_v16  ;;  %v3577_v52 = vadd.f32 %v3576_v43, %v3575_v3  ;;  %v5230_v57 = vadd.f32 %v3574_v63, %v2149_v34 }
 0x301   : > { %v3466_v9 = vpop.f32.mrb[96].mxu1  ;;  %v5232_v55 = vadd.f32 %v3577_v52, %v2152_v49 }
 0x302   : > { %v3467_v5 = vpop.f32.mrb[97].mxu1 }
 0x303   : > { %v3468_v32 = vadd.f32 %v3467_v5, %v3466_v9  ;;  %v3578_v39 = vpop.f32.mrb[96].mxu0  ;;  %v3469_v13 = vpop.f32.mrb[98].mxu1 }
 0x304   : > { %v3579_v51 = vpop.f32.mrb[97].mxu0  ;;  %v3470_v60 = vpop.f32.mrb[99].mxu1 }
 0x305   : > { %v2157_v23 = vadd.f32 %v3468_v32, %v5122_v10  ;;  %v3580_v1 = vadd.f32 %v3579_v51, %v3578_v39  ;;  %v3471_v36 = vadd.f32 %v3470_v60, %v3469_v13  ;;  %v3581_v19 = vpop.f32.mrb[98].mxu0 }
 0x306   : > { %v3582_v61 = vpop.f32.mrb[99].mxu0 }
 0x307   : > { %v2160_v16 = vadd.f32 %v3471_v36, %v5127_v33  ;;  %v3583_v30 = vadd.f32 %v3582_v61, %v3581_v19  ;;  %v5236_v11 = vadd.f32 %v3580_v1, %v2157_v23 }
 0x309   : > { %v3472_v12 = vpop.f32.mrb[100].mxu1  ;;  %v5238_v22 = vadd.f32 %v3583_v30, %v2160_v16 }
 0x30a   : > { %v3473_v17 = vpop.f32.mrb[101].mxu1 }
 0x30b   : > { %v3474_v29 = vadd.f32 %v3473_v17, %v3472_v12  ;;  %v3584_v47 = vpop.f32.mrb[100].mxu0  ;;  %v3475_v38 = vpop.f32.mrb[102].mxu1 }
 0x30c   : > { %v3585_v56 = vpop.f32.mrb[101].mxu0  ;;  %v3476_v62 = vpop.f32.mrb[103].mxu1 }
 0x30d   : > { %v2165_v10 = vadd.f32 %v3474_v29, %v5131_v21  ;;  %v3586_v37 = vadd.f32 %v3585_v56, %v3584_v47  ;;  %v3477_v59 = vadd.f32 %v3476_v62, %v3475_v38  ;;  %v3587_v34 = vpop.f32.mrb[102].mxu0 }
 0x30e   : > { %v3588_v63 = vpop.f32.mrb[103].mxu0 }
 0x30f   : > { %v2168_v33 = vadd.f32 %v3477_v59, %v5135_v42  ;;  %v3589_v15 = vadd.f32 %v3588_v63, %v3587_v34  ;;  %v5242_v3 = vadd.f32 %v3586_v37, %v2165_v10 }
 0x311   : > { %v3478_v43 = vpop.f32.mrb[104].mxu1  ;;  %v5244_v49 = vadd.f32 %v3589_v15, %v2168_v33 }
 0x312   : > { %v3479_v52 = vpop.f32.mrb[105].mxu1 }
 0x313   : > { %v3480_v9 = vadd.f32 %v3479_v52, %v3478_v43  ;;  %v3590_v5 = vpop.f32.mrb[104].mxu0  ;;  %v3481_v32 = vpop.f32.mrb[106].mxu1 }
 0x314   : > { %v3591_v39 = vpop.f32.mrb[105].mxu0  ;;  %v3482_v13 = vpop.f32.mrb[107].mxu1 }
 0x315   : > { %v2173_v21 = vadd.f32 %v3480_v9, %v5139_v27  ;;  %v3592_v51 = vadd.f32 %v3591_v39, %v3590_v5  ;;  %v3483_v60 = vadd.f32 %v3482_v13, %v3481_v32  ;;  %v3593_v23 = vpop.f32.mrb[106].mxu0 }
 0x316   : > { %v3594_v1 = vpop.f32.mrb[107].mxu0 }
 0x317   : > { %v2176_v42 = vadd.f32 %v3483_v60, %v5143_v44  ;;  %v3595_v36 = vadd.f32 %v3594_v1, %v3593_v23  ;;  %v5248_v19 = vadd.f32 %v3592_v51, %v2173_v21 }
 0x319   : > { %v3484_v61 = vpop.f32.mrb[108].mxu1  ;;  %v5250_v16 = vadd.f32 %v3595_v36, %v2176_v42 }
 0x31a   : > { %v3485_v30 = vpop.f32.mrb[109].mxu1 }
 0x31b   : > { %v3486_v12 = vadd.f32 %v3485_v30, %v3484_v61  ;;  %v3596_v17 = vpop.f32.mrb[108].mxu0  ;;  %v3487_v29 = vpop.f32.mrb[110].mxu1 }
 0x31c   : > { %v3597_v47 = vpop.f32.mrb[109].mxu0  ;;  %v3488_v38 = vpop.f32.mrb[111].mxu1 }
 0x31d   : > { %v2181_v27 = vadd.f32 %v3486_v12, %v5147_v4  ;;  %v3598_v56 = vadd.f32 %v3597_v47, %v3596_v17  ;;  %v3489_v62 = vadd.f32 %v3488_v38, %v3487_v29  ;;  %v3599_v10 = vpop.f32.mrb[110].mxu0 }
 0x31e   : > { %v3600_v37 = vpop.f32.mrb[111].mxu0 }
 0x31f   : > { %v2184_v44 = vadd.f32 %v3489_v62, %v5151_v14  ;;  %v3601_v59 = vadd.f32 %v3600_v37, %v3599_v10  ;;  %v5254_v34 = vadd.f32 %v3598_v56, %v2181_v27 }
 0x321   : > { %v3490_v63 = vpop.f32.mrb[112].mxu1  ;;  %v5256_v33 = vadd.f32 %v3601_v59, %v2184_v44 }
 0x322   : > { %v3491_v15 = vpop.f32.mrb[113].mxu1 }
 0x323   : > { %v3492_v43 = vadd.f32 %v3491_v15, %v3490_v63  ;;  %v3602_v52 = vpop.f32.mrb[112].mxu0  ;;  %v3493_v9 = vpop.f32.mrb[114].mxu1 }
 0x324   : > { %v3603_v5 = vpop.f32.mrb[113].mxu0  ;;  %v3494_v32 = vpop.f32.mrb[115].mxu1 }
 0x325   : > { %v2189_v4 = vadd.f32 %v3492_v43, %v5155_v28  ;;  %v3604_v39 = vadd.f32 %v3603_v5, %v3602_v52  ;;  %v3495_v13 = vadd.f32 %v3494_v32, %v3493_v9  ;;  %v3605_v21 = vpop.f32.mrb[114].mxu0 }
 0x326   : > { %v3606_v51 = vpop.f32.mrb[115].mxu0 }
 0x327   : > { %v2192_v14 = vadd.f32 %v3495_v13, %v5159_v50  ;;  %v3607_v60 = vadd.f32 %v3606_v51, %v3605_v21  ;;  %v5260_v23 = vadd.f32 %v3604_v39, %v2189_v4 }
 0x329   : > { %v3496_v1 = vpop.f32.mrb[116].mxu1  ;;  %v5262_v42 = vadd.f32 %v3607_v60, %v2192_v14 }
 0x32a   : > { %v3497_v36 = vpop.f32.mrb[117].mxu1 }
 0x32b   : > { %v3498_v61 = vadd.f32 %v3497_v36, %v3496_v1  ;;  %v3608_v30 = vpop.f32.mrb[116].mxu0  ;;  %v3499_v12 = vpop.f32.mrb[118].mxu1 }
 0x32c   : > { %v3609_v17 = vpop.f32.mrb[117].mxu0  ;;  %v3500_v29 = vpop.f32.mrb[119].mxu1 }
 0x32d   : > { %v2197_v28 = vadd.f32 %v3498_v61, %v5163_v2  ;;  %v3610_v47 = vadd.f32 %v3609_v17, %v3608_v30  ;;  %v3501_v38 = vadd.f32 %v3500_v29, %v3499_v12  ;;  %v3611_v27 = vpop.f32.mrb[118].mxu0 }
 0x32e   : > { %v3612_v56 = vpop.f32.mrb[119].mxu0 }
 0x32f   : > { %v2200_v50 = vadd.f32 %v3501_v38, %v5167_v45  ;;  %v3613_v62 = vadd.f32 %v3612_v56, %v3611_v27  ;;  %v5266_v10 = vadd.f32 %v3610_v47, %v2197_v28 }
 0x331   : > { %v3502_v37 = vpop.f32.mrb[120].mxu1  ;;  %v5268_v44 = vadd.f32 %v3613_v62, %v2200_v50 }
 0x332   : > { %v3503_v59 = vpop.f32.mrb[121].mxu1 }
 0x333   : > { %v3504_v63 = vadd.f32 %v3503_v59, %v3502_v37  ;;  %v3614_v15 = vpop.f32.mrb[120].mxu0  ;;  %v3505_v43 = vpop.f32.mrb[122].mxu1 }
 0x334   : > { %v3615_v52 = vpop.f32.mrb[121].mxu0  ;;  %v3506_v9 = vpop.f32.mrb[123].mxu1 }
 0x335   : > { %v2205_v2 = vadd.f32 %v3504_v63, %v5171_v48  ;;  %v3616_v5 = vadd.f32 %v3615_v52, %v3614_v15  ;;  %v3507_v32 = vadd.f32 %v3506_v9, %v3505_v43  ;;  %v3617_v4 = vpop.f32.mrb[122].mxu0 }
 0x336   : > { %v3618_v39 = vpop.f32.mrb[123].mxu0 }
 0x337   : > { %v2208_v45 = vadd.f32 %v3507_v32, %v5175_v18  ;;  %v3619_v13 = vadd.f32 %v3618_v39, %v3617_v4  ;;  %v5272_v21 = vadd.f32 %v3616_v5, %v2205_v2 }
 0x339   : > { %v3508_v51 = vpop.f32.mrb[124].mxu1  ;;  %v5274_v14 = vadd.f32 %v3619_v13, %v2208_v45 }
 0x33a   : > { %v3509_v60 = vpop.f32.mrb[125].mxu1 }
 0x33b   : > { %v3510_v1 = vadd.f32 %v3509_v60, %v3508_v51  ;;  %v3620_v36 = vpop.f32.mrb[124].mxu0  ;;  %v3511_v61 = vpop.f32.mrb[126].mxu1 }
 0x33c   : > { %v3621_v30 = vpop.f32.mrb[125].mxu0  ;;  %v3512_v12 = vpop.f32.mrb[127].mxu1 }
 0x33d   : > { %v2213_v48 = vadd.f32 %v3510_v1, %v5179_v40  ;;  %v3622_v17 = vadd.f32 %v3621_v30, %v3620_v36  ;;  %v3513_v29 = vadd.f32 %v3512_v12, %v3511_v61  ;;  %v3623_v28 = vpop.f32.mrb[126].mxu0 }
 0x33e   : > { %v3624_v47 = vpop.f32.mrb[127].mxu0 }
 0x33f   : > { %v2216_v18 = vadd.f32 %v3513_v29, %v5183_v31  ;;  %v3625_v38 = vadd.f32 %v3624_v47, %v3623_v28  ;;  %v5278_v27 = vadd.f32 %v3622_v17, %v2213_v48 }
 0x341   : > { %v3514_v56 = vpop.f32.mrb[128].mxu1  ;;  %v5280_v50 = vadd.f32 %v3625_v38, %v2216_v18 }
 0x342   : > { %v3515_v62 = vpop.f32.mrb[129].mxu1 }
 0x343   : > { %v3516_v37 = vadd.f32 %v3515_v62, %v3514_v56  ;;  %v3626_v59 = vpop.f32.mrb[128].mxu0  ;;  %v3517_v63 = vpop.f32.mrb[130].mxu1 }
 0x344   : > { %v3627_v15 = vpop.f32.mrb[129].mxu0  ;;  %v3518_v43 = vpop.f32.mrb[131].mxu1 }
 0x345   : > { %v2221_v40 = vadd.f32 %v3516_v37, %v5187_v0  ;;  %v3628_v52 = vadd.f32 %v3627_v15, %v3626_v59  ;;  %v3519_v9 = vadd.f32 %v3518_v43, %v3517_v63  ;;  %v3629_v2 = vpop.f32.mrb[130].mxu0 }
 0x346   : > { %v3630_v5 = vpop.f32.mrb[131].mxu0 }
 0x347   : > { %v2224_v31 = vadd.f32 %v3519_v9, %v5190_v35  ;;  %v3631_v32 = vadd.f32 %v3630_v5, %v3629_v2  ;;  %v5284_v4 = vadd.f32 %v3628_v52, %v2221_v40 }
 0x349   : > { %v3520_v39 = vpop.f32.mrb[132].mxu1  ;;  %v5286_v45 = vadd.f32 %v3631_v32, %v2224_v31 }
 0x34a   : > { %v3521_v13 = vpop.f32.mrb[133].mxu1 }
 0x34b   : > { %v3522_v51 = vadd.f32 %v3521_v13, %v3520_v39  ;;  %v3632_v60 = vpop.f32.mrb[132].mxu0  ;;  %v3523_v1 = vpop.f32.mrb[134].mxu1 }
 0x34c   : > { %v3633_v36 = vpop.f32.mrb[133].mxu0  ;;  %v3524_v61 = vpop.f32.mrb[135].mxu1 }
 0x34d   : > { %v2229_v0 = vadd.f32 %v3522_v51, %v5193_v24  ;;  %v3634_v30 = vadd.f32 %v3633_v36, %v3632_v60  ;;  %v3525_v12 = vadd.f32 %v3524_v61, %v3523_v1  ;;  %v3635_v48 = vpop.f32.mrb[134].mxu0 }
 0x34e   : > { %v3636_v17 = vpop.f32.mrb[135].mxu0 }
 0x34f   : > { %v2232_v35 = vadd.f32 %v3525_v12, %v5196_v20  ;;  %v3637_v29 = vadd.f32 %v3636_v17, %v3635_v48  ;;  %v5290_v28 = vadd.f32 %v3634_v30, %v2229_v0 }
 0x351   : > { %v3526_v47 = vpop.f32.mrb[136].mxu1  ;;  %v5292_v18 = vadd.f32 %v3637_v29, %v2232_v35 }
 0x352   : > { %v3527_v38 = vpop.f32.mrb[137].mxu1 }
 0x353   : > { %v3528_v56 = vadd.f32 %v3527_v38, %v3526_v47  ;;  %v3638_v62 = vpop.f32.mrb[136].mxu0  ;;  %v3529_v37 = vpop.f32.mrb[138].mxu1 }
 0x354   : > { %v3639_v59 = vpop.f32.mrb[137].mxu0  ;;  %v3530_v63 = vpop.f32.mrb[139].mxu1 }
 0x355   : > { %v2237_v24 = vadd.f32 %v3528_v56, %v5199_v58  ;;  %v3640_v15 = vadd.f32 %v3639_v59, %v3638_v62  ;;  %v3531_v43 = vadd.f32 %v3530_v63, %v3529_v37  ;;  %v3641_v40 = vpop.f32.mrb[138].mxu0 }
 0x356   : > { %v3642_v52 = vpop.f32.mrb[139].mxu0 }
 0x357   : > { %v2240_v20 = vadd.f32 %v3531_v43, %v5202_v54  ;;  %v3643_v9 = vadd.f32 %v3642_v52, %v3641_v40  ;;  %v5296_v2 = vadd.f32 %v3640_v15, %v2237_v24 }
 0x359   : > { %v3532_v5 = vpop.f32.mrb[140].mxu1  ;;  %v5298_v31 = vadd.f32 %v3643_v9, %v2240_v20 }
 0x35a   : > { %v3533_v32 = vpop.f32.mrb[141].mxu1 }
 0x35b   : > { %v3534_v39 = vadd.f32 %v3533_v32, %v3532_v5  ;;  %v3535_v13 = vpop.f32.mrb[142].mxu1  ;;  %v3644_v51 = vpop.f32.mrb[140].mxu0 }
 0x35c   : > { %v3536_v60 = vpop.f32.mrb[143].mxu1  ;;  %v3645_v1 = vpop.f32.mrb[141].mxu0 }
 0x35d   : > { %v2245_v58 = vadd.f32 %v3534_v39, %v5205_v6  ;;  %v3537_v36 = vadd.f32 %v3536_v60, %v3535_v13  ;;  %v3646_v61 = vadd.f32 %v3645_v1, %v3644_v51  ;;  %v3647_v0 = vpop.f32.mrb[142].mxu0 }
 0x35e   : > { %v3648_v30 = vpop.f32.mrb[143].mxu0 }
 0x35f   : > { %v2248_v54 = vadd.f32 %v3537_v36, %v5208_v8  ;;  %v3649_v12 = vadd.f32 %v3648_v30, %v3647_v0  ;;  %v5302_v48 = vadd.f32 %v3646_v61, %v2245_v58 }
 0x361   : > { %v3764_v17 = vpop.f32.mrb[144].mxu1  ;;  %v5304_v35 = vadd.f32 %v3649_v12, %v2248_v54 }
 0x362   : > { %v2455_v29 = vadd.f32 %v3764_v17, %v5218_v26  ;;  %v2446_v47 = vpop.f32.mrb[145].mxu1 }
 0x363   : > { %v2447_v38 = vadd.f32 %v2446_v47, %v5212_v53  ;;  %v3765_v56 = vpop.f32.mrb[146].mxu1 }
 0x364   : > { %v2458_v6 = vadd.f32 %v3765_v56, %v5220_v41  ;;  %v2449_v62 = vpop.f32.mrb[147].mxu1  ;;  %v2575_v59 = vmax.f32 %v2455_v29, 0.0 }
 0x365   : > { %v2450_v37 = vadd.f32 %v2449_v62, %v5214_v25  ;;  %v2573_v8 = vmax.f32 %v2447_v38, 0.0 }
 0x366   : > { %v2576_v63 = vmax.f32 %v2458_v6, 0.0 }
 0x367   : > { %v2574_v24 = vmax.f32 %v2450_v37, 0.0 }
 0x368   : > { %v2606_v15 = vpack.c.bf16 %v2576_v63, %v2575_v59 }
 0x369   : > { %v2605_v43 = vpack.c.bf16 %v2574_v24, %v2573_v8  ;;  %v3768_v40 = vpop.f32.mrb[148].mxu1 }
 0x36a   : > { %v2471_v52 = vadd.f32 %v3768_v40, %v5230_v57  ;;  %v2462_v20 = vpop.f32.mrb[149].mxu1 }
 0x36b   : > { %v2463_v26 = vadd.f32 %v2462_v20, %v5224_v7  ;;  %v3769_v9 = vpop.f32.mrb[150].mxu1  ;;  %3810 = vmatprep.mubr.bf16.mxu0 %v2605_v43 }
 0x36c   : > { %v2474_v53 = vadd.f32 %v3769_v9, %v5232_v55  ;;  %v2465_v41 = vpop.f32.mrb[151].mxu1  ;;  %3811 = vmatmul.mubr.bf16.vlgmr.msra.gmra.mrb[144].mxu0 %v2606_v15  ;;  %v2579_v5 = vmax.f32 %v2471_v52, 0.0 }
 0x36d   : > { %v2466_v25 = vadd.f32 %v2465_v41, %v5226_v46  ;;  %v2577_v39 = vmax.f32 %v2463_v26, 0.0 }
 0x36e   : > { %v2580_v32 = vmax.f32 %v2474_v53, 0.0 }
 0x36f   : > { %v2578_v13 = vmax.f32 %v2466_v25, 0.0 }
 0x370   : > { %v2608_v51 = vpack.c.bf16 %v2580_v32, %v2579_v5 }
 0x371   : > { %v2607_v60 = vpack.c.bf16 %v2578_v13, %v2577_v39  ;;  %v3772_v1 = vpop.f32.mrb[152].mxu1 }
 0x372   : > { %v2487_v57 = vadd.f32 %v3772_v1, %v5242_v3  ;;  %v2478_v58 = vpop.f32.mrb[153].mxu1 }
 0x373   : > { %v2479_v7 = vadd.f32 %v2478_v58, %v5236_v11  ;;  %v3773_v36 = vpop.f32.mrb[154].mxu1  ;;  %3814 = vmatprep.mubr.bf16.mxu0 %v2607_v60 }
 0x374   : > { %v2490_v55 = vadd.f32 %v3773_v36, %v5244_v49  ;;  %v2481_v61 = vpop.f32.mrb[155].mxu1  ;;  %3815 = vmatmul.mubr.bf16.gmra.mrb[148].mxu0 %v2608_v51  ;;  %v2583_v0 = vmax.f32 %v2487_v57, 0.0 }
 0x375   : > { %v2482_v46 = vadd.f32 %v2481_v61, %v5238_v22  ;;  %v2581_v54 = vmax.f32 %v2479_v7, 0.0 }
 0x376   : > { %v2584_v30 = vmax.f32 %v2490_v55, 0.0 }
 0x377   : > { %v2582_v12 = vmax.f32 %v2482_v46, 0.0 }
 0x378   : > { %v2610_v17 = vpack.c.bf16 %v2584_v30, %v2583_v0 }
 0x379   : > { %v2609_v29 = vpack.c.bf16 %v2582_v12, %v2581_v54  ;;  %v3776_v47 = vpop.f32.mrb[156].mxu1 }
 0x37a   : > { %v2503_v3 = vadd.f32 %v3776_v47, %v5254_v34  ;;  %v2494_v38 = vpop.f32.mrb[157].mxu1 }
 0x37b   : > { %v2495_v11 = vadd.f32 %v2494_v38, %v5248_v19  ;;  %v3777_v56 = vpop.f32.mrb[158].mxu1  ;;  %3818 = vmatprep.mubr.bf16.mxu0 %v2609_v29 }
 0x37c   : > { %v2506_v49 = vadd.f32 %v3777_v56, %v5256_v33  ;;  %v2497_v6 = vpop.f32.mrb[159].mxu1  ;;  %3819 = vmatmul.mubr.bf16.gmra.mrb[152].mxu0 %v2610_v17  ;;  %v2587_v62 = vmax.f32 %v2503_v3, 0.0 }
 0x37d   : > { %v2498_v22 = vadd.f32 %v2497_v6, %v5250_v16  ;;  %v2585_v59 = vmax.f32 %v2495_v11, 0.0 }
 0x37e   : > { %v2588_v37 = vmax.f32 %v2506_v49, 0.0 }
 0x37f   : > { %v2586_v63 = vmax.f32 %v2498_v22, 0.0 }
 0x380   : > { %v2612_v8 = vpack.c.bf16 %v2588_v37, %v2587_v62 }
 0x381   : > { %v2611_v24 = vpack.c.bf16 %v2586_v63, %v2585_v59  ;;  %v3780_v15 = vpop.f32.mrb[160].mxu1 }
 0x382   : > { %v2519_v34 = vadd.f32 %v3780_v15, %v5266_v10  ;;  %v2510_v43 = vpop.f32.mrb[161].mxu1 }
 0x383   : > { %v2511_v19 = vadd.f32 %v2510_v43, %v5260_v23  ;;  %v3781_v40 = vpop.f32.mrb[162].mxu1  ;;  %3822 = vmatprep.mubr.bf16.mxu0 %v2611_v24  ;;  %v4031_v43 = vld [vmem:[%s4512_s20] sm:$0xff] }
 0x384   : > { %v2522_v33 = vadd.f32 %v3781_v40, %v5268_v44  ;;  %v2513_v52 = vpop.f32.mrb[163].mxu1  ;;  %3823 = vmatmul.mubr.bf16.gmra.mrb[156].mxu0 %v2612_v8  ;;  %v2591_v20 = vmax.f32 %v2519_v34, 0.0  ;;  %v4030_v8 = vld [vmem:[%s4512_s20 + $0x10] sm:$0xff] }
 0x385   : > { %v2514_v16 = vadd.f32 %v2513_v52, %v5262_v42  ;;  %v2589_v9 = vmax.f32 %v2511_v19, 0.0  ;;  %v4032_v52 = vld [vmem:[%s4512_s20 + $0x18] sm:$0xff] }
 0x386   : > { %v2592_v26 = vmax.f32 %v2522_v33, 0.0 }
 0x387   : > { %v2590_v53 = vmax.f32 %v2514_v16, 0.0 }
 0x388   : > { %v2614_v41 = vpack.c.bf16 %v2592_v26, %v2591_v20  ;;  %v4033_v26 = vld [vmem:[%s4512_s20 + $0x8] sm:$0xff] }
 0x389   : > { %v2613_v25 = vpack.c.bf16 %v2590_v53, %v2589_v9  ;;  %v3784_v5 = vpop.f32.mrb[164].mxu1 }
 0x38a   : > { %v2535_v10 = vadd.f32 %v3784_v5, %v5278_v27  ;;  %v2526_v32 = vpop.f32.mrb[165].mxu1 }
 0x38b   : > { %v2527_v23 = vadd.f32 %v2526_v32, %v5272_v21  ;;  %v3785_v39 = vpop.f32.mrb[166].mxu1  ;;  %3826 = vmatprep.mubr.bf16.mxu0 %v2613_v25 }
 0x38c   : > { %v2538_v44 = vadd.f32 %v3785_v39, %v5280_v50  ;;  %v2529_v13 = vpop.f32.mrb[167].mxu1  ;;  %3827 = vmatmul.mubr.bf16.gmra.mrb[160].mxu0 %v2614_v41  ;;  %v2595_v51 = vmax.f32 %v2535_v10, 0.0  ;;  %v4034_v39 = vld [vmem:[%s4512_s20 + $0x30] sm:$0xff] }
 0x38d   : > { %v2530_v42 = vadd.f32 %v2529_v13, %v5274_v14  ;;  %v2593_v1 = vmax.f32 %v2527_v23, 0.0 }
 0x38e   : > { %v2596_v60 = vmax.f32 %v2538_v44, 0.0 }
 0x38f   : > { %v2594_v57 = vmax.f32 %v2530_v42, 0.0 }
 0x390   : > { %v2616_v58 = vpack.c.bf16 %v2596_v60, %v2595_v51  ;;  %v4035_v51 = vld [vmem:[%s4512_s20 + $0x20] sm:$0xff] }
 0x391   : > { %v2615_v7 = vpack.c.bf16 %v2594_v57, %v2593_v1  ;;  %v3788_v36 = vpop.f32.mrb[168].mxu1 }
 0x392   : > { %v2551_v27 = vadd.f32 %v3788_v36, %v5290_v28  ;;  %v2542_v55 = vpop.f32.mrb[169].mxu1 }
 0x393   : > { %v2543_v21 = vadd.f32 %v2542_v55, %v5284_v4  ;;  %v3789_v61 = vpop.f32.mrb[170].mxu1  ;;  %3830 = vmatprep.mubr.bf16.mxu0 %v2615_v7 }
 0x394   : > { %v2554_v50 = vadd.f32 %v3789_v61, %v5292_v18  ;;  %v2545_v46 = vpop.f32.mrb[171].mxu1  ;;  %3831 = vmatmul.mubr.bf16.gmra.mrb[164].mxu0 %v2616_v58  ;;  %v2599_v0 = vmax.f32 %v2551_v27, 0.0  ;;  %v4036_v58 = vld [vmem:[%s4512_s20 + $0x38] sm:$0xff]  ;;  %v4037_v27 = vld [vmem:[%s4512_s20 + $0x28] sm:$0xff] }
 0x395   : > { %v2546_v14 = vadd.f32 %v2545_v46, %v5286_v45  ;;  %v2597_v54 = vmax.f32 %v2543_v21, 0.0 }
 0x396   : > { %v2600_v30 = vmax.f32 %v2554_v50, 0.0 }
 0x397   : > { %v2598_v12 = vmax.f32 %v2546_v14, 0.0 }
 0x398   : > { %v2618_v17 = vpack.c.bf16 %v2600_v30, %v2599_v0 }
 0x399   : > { %v2617_v29 = vpack.c.bf16 %v2598_v12, %v2597_v54  ;;  %v3792_v47 = vpop.f32.mrb[172].mxu1  ;;  %v4038_v54 = vld [vmem:[%s4512_s20 + $0x50] sm:$0xff] }
 0x39a   : > { %v2567_v28 = vadd.f32 %v3792_v47, %v5302_v48  ;;  %v2558_v3 = vpop.f32.mrb[173].mxu1  ;;  %v4039_v47 = vld [vmem:[%s4512_s20 + $0x40] sm:$0xff] }
 0x39b   : > { %v2559_v4 = vadd.f32 %v2558_v3, %v5296_v2  ;;  %v3793_v38 = vpop.f32.mrb[174].mxu1  ;;  %3834 = vmatprep.mubr.bf16.mxu0 %v2617_v29  ;;  %v5341_v2 = vld [vmem:[%s5500_s6] ss:$0 sm:$0xff] }
 0x39c   : > { %v2570_v18 = vadd.f32 %v3793_v38, %v5304_v35  ;;  %v2561_v11 = vpop.f32.mrb[175].mxu1  ;;  %3835 = vmatmul.mubr.bf16.gmra.mrb[168].mxu0 %v2618_v17  ;;  %v2603_v56 = vmax.f32 %v2567_v28, 0.0  ;;  %v4040_v38 = vld [vmem:[%s4512_s20 + $0x58] sm:$0xff] }
 0x39d   : > { %v2562_v45 = vadd.f32 %v2561_v11, %v5298_v31  ;;  %v2601_v6 = vmax.f32 %v2559_v4, 0.0 }
 0x39e   : > { %v2604_v49 = vmax.f32 %v2570_v18, 0.0 }
 0x39f   : > { %v2602_v22 = vmax.f32 %v2562_v45, 0.0  ;;  %v4041_v45 = vld [vmem:[%s4512_s20 + $0x48] sm:$0xff] }
 0x3a0   : > { %v2620_v62 = vpack.c.bf16 %v2604_v49, %v2603_v56 }
 0x3a1   : > { %v2619_v37 = vpack.c.bf16 %v2602_v22, %v2601_v6 }
 0x3a3   : > { %3838 = vmatprep.mubr.bf16.mxu0 %v2619_v37 }
 0x3a4   : > { %3839 = vmatmul.mubr.bf16.gmra.mrb[172].mxu0 %v2620_v62 }
 0x43f   : > { %v3812_v48 = vpop.f32.mrb[144].mxu0 }
 0x440   : > { %v2735_v35 = vadd.f32 %v3812_v48, %v5341_v2  ;;  %v2726_v31 = vpop.f32.mrb[145].mxu0 }
 0x441   : > { %v2727_v59 = vadd.f32 %v5341_v2, %v2726_v31  ;;  %v3813_v63 = vpop.f32.mrb[146].mxu0  ;;  %v4042_v31 = vld [vmem:[%s4512_s20 + $0x70] sm:$0xff] }
 0x442   : > { %v2855_v24 = vadd.f32 %v4030_v8, %v2735_v35  ;;  %v2738_v15 = vadd.f32 %v3813_v63, %v5341_v2  ;;  %v2729_v34 = vpop.f32.mrb[147].mxu0 }
 0x443   : > { %v2853_v19 = vadd.f32 %v4031_v43, %v2727_v59  ;;  %v2730_v40 = vadd.f32 %v5341_v2, %v2729_v34 }
 0x444   : > { %v2887_v33 = vmax.f32 %v2855_v24, 0.0  ;;  %v2856_v16 = vadd.f32 %v4032_v52, %v2738_v15  ;;  %v4043_v24 = vld [vmem:[%s4512_s20 + $0x60] sm:$0xff]  ;;  %v4045_v52 = vld [vmem:[%s4512_s20 + $0x68] sm:$0xff] }
 0x445   : > { %v2885_v20 = vmax.f32 %v2853_v19, 0.0  ;;  %v2854_v9 = vadd.f32 %v4033_v26, %v2730_v40  ;;  %v4044_v19 = vld [vmem:[%s4512_s20 + $0x78] sm:$0xff] }
 0x446   : > { %2919 = vst [vmem:[%s5353_s15 + $0x10] sm:$0xff] %v2887_v33  ;;  %v2888_v53 = vmax.f32 %v2856_v16, 0.0 }
 0x447   : > { %2917 = vst [vmem:[%s5353_s15] sm:$0xff] %v2885_v20  ;;  %v2886_v41 = vmax.f32 %v2854_v9, 0.0  ;;  %v3816_v25 = vpop.f32.mrb[148].mxu0 }
 0x448   : > { %2920 = vst [vmem:[%s5353_s15 + $0x18] sm:$0xff] %v2888_v53  ;;  %v2751_v5 = vadd.f32 %v3816_v25, %v5341_v2  ;;  %v2742_v10 = vpop.f32.mrb[149].mxu0 }
 0x449   : > { %2918 = vst [vmem:[%s5353_s15 + $0x8] sm:$0xff] %v2886_v41  ;;  %v2743_v32 = vadd.f32 %v5341_v2, %v2742_v10  ;;  %v3817_v23 = vpop.f32.mrb[150].mxu0  ;;  %v4046_v10 = vld [vmem:[%s4512_s20 + $0x90] sm:$0xff] }
 0x44a   : > { %v2859_v44 = vadd.f32 %v4034_v39, %v2751_v5  ;;  %v2754_v13 = vadd.f32 %v3817_v23, %v5341_v2  ;;  %v2745_v42 = vpop.f32.mrb[151].mxu0 }
 0x44b   : > { %v2857_v60 = vadd.f32 %v4035_v51, %v2743_v32  ;;  %v2746_v1 = vadd.f32 %v5341_v2, %v2745_v42 }
 0x44c   : > { %v2891_v57 = vmax.f32 %v2859_v44, 0.0  ;;  %v2860_v7 = vadd.f32 %v4036_v58, %v2754_v13  ;;  %v4047_v44 = vld [vmem:[%s4512_s20 + $0x80] sm:$0xff]  ;;  %v4049_v58 = vld [vmem:[%s4512_s20 + $0x88] sm:$0xff] }
 0x44d   : > { %v2889_v36 = vmax.f32 %v2857_v60, 0.0  ;;  %v2858_v55 = vadd.f32 %v4037_v27, %v2746_v1  ;;  %v4048_v60 = vld [vmem:[%s4512_s20 + $0x98] sm:$0xff] }
 0x44e   : > { %2923 = vst [vmem:[%s5353_s15 + $0x30] sm:$0xff] %v2891_v57  ;;  %v2892_v21 = vmax.f32 %v2860_v7, 0.0 }
 0x44f   : > { %2921 = vst [vmem:[%s5353_s15 + $0x20] sm:$0xff] %v2889_v36  ;;  %v2890_v61 = vmax.f32 %v2858_v55, 0.0  ;;  %v3820_v50 = vpop.f32.mrb[152].mxu0 }
 0x450   : > { %2924 = vst [vmem:[%s5353_s15 + $0x38] sm:$0xff] %v2892_v21  ;;  %v2767_v46 = vadd.f32 %v3820_v50, %v5341_v2  ;;  %v2758_v14 = vpop.f32.mrb[153].mxu0 }
 0x451   : > { %2922 = vst [vmem:[%s5353_s15 + $0x28] sm:$0xff] %v2890_v61  ;;  %v2759_v0 = vadd.f32 %v5341_v2, %v2758_v14  ;;  %v3821_v30 = vpop.f32.mrb[154].mxu0  ;;  %v4050_v14 = vld [vmem:[%s4512_s20 + $0xb0] sm:$0xff] }
 0x452   : > { %v2863_v12 = vadd.f32 %v4038_v54, %v2767_v46  ;;  %v2770_v17 = vadd.f32 %v3821_v30, %v5341_v2  ;;  %v2761_v29 = vpop.f32.mrb[155].mxu0 }
 0x453   : > { %v2861_v28 = vadd.f32 %v4039_v47, %v2759_v0  ;;  %v2762_v3 = vadd.f32 %v5341_v2, %v2761_v29 }
 0x454   : > { %v2895_v4 = vmax.f32 %v2863_v12, 0.0  ;;  %v2864_v18 = vadd.f32 %v4040_v38, %v2770_v17  ;;  %v4051_v12 = vld [vmem:[%s4512_s20 + $0xa0] sm:$0xff]  ;;  %v4053_v38 = vld [vmem:[%s4512_s20 + $0xa8] sm:$0xff] }
 0x455   : > { %v2893_v11 = vmax.f32 %v2861_v28, 0.0  ;;  %v2862_v56 = vadd.f32 %v4041_v45, %v2762_v3  ;;  %v4052_v28 = vld [vmem:[%s4512_s20 + $0xb8] sm:$0xff] }
 0x456   : > { %2927 = vst [vmem:[%s5353_s15 + $0x50] sm:$0xff] %v2895_v4  ;;  %v2896_v49 = vmax.f32 %v2864_v18, 0.0 }
 0x457   : > { %2925 = vst [vmem:[%s5353_s15 + $0x40] sm:$0xff] %v2893_v11  ;;  %v2894_v6 = vmax.f32 %v2862_v56, 0.0  ;;  %v3824_v22 = vpop.f32.mrb[156].mxu0 }
 0x458   : > { %2928 = vst [vmem:[%s5353_s15 + $0x58] sm:$0xff] %v2896_v49  ;;  %v2783_v62 = vadd.f32 %v3824_v22, %v5341_v2  ;;  %v2774_v37 = vpop.f32.mrb[157].mxu0 }
 0x459   : > { %2926 = vst [vmem:[%s5353_s15 + $0x48] sm:$0xff] %v2894_v6  ;;  %v2775_v48 = vadd.f32 %v5341_v2, %v2774_v37  ;;  %v3825_v35 = vpop.f32.mrb[158].mxu0  ;;  %v4054_v37 = vld [vmem:[%s4512_s20 + $0xd0] sm:$0xff] }
 0x45a   : > { %v2867_v59 = vadd.f32 %v4042_v31, %v2783_v62  ;;  %v2786_v63 = vadd.f32 %v3825_v35, %v5341_v2  ;;  %v2777_v8 = vpop.f32.mrb[159].mxu0 }
 0x45b   : > { %v2865_v15 = vadd.f32 %v4043_v24, %v2775_v48  ;;  %v2778_v34 = vadd.f32 %v5341_v2, %v2777_v8 }
 0x45c   : > { %v2899_v43 = vmax.f32 %v2867_v59, 0.0  ;;  %v2868_v40 = vadd.f32 %v4044_v19, %v2786_v63  ;;  %v4055_v59 = vld [vmem:[%s4512_s20 + $0xc0] sm:$0xff]  ;;  %v4057_v19 = vld [vmem:[%s4512_s20 + $0xc8] sm:$0xff] }
 0x45d   : > { %v2897_v33 = vmax.f32 %v2865_v15, 0.0  ;;  %v2866_v16 = vadd.f32 %v4045_v52, %v2778_v34  ;;  %v4056_v15 = vld [vmem:[%s4512_s20 + $0xd8] sm:$0xff] }
 0x45e   : > { %2931 = vst [vmem:[%s5353_s15 + $0x70] sm:$0xff] %v2899_v43  ;;  %v2900_v20 = vmax.f32 %v2868_v40, 0.0 }
 0x45f   : > { %2929 = vst [vmem:[%s5353_s15 + $0x60] sm:$0xff] %v2897_v33  ;;  %v2898_v26 = vmax.f32 %v2866_v16, 0.0  ;;  %v3828_v9 = vpop.f32.mrb[160].mxu0 }
 0x460   : > { %2932 = vst [vmem:[%s5353_s15 + $0x78] sm:$0xff] %v2900_v20  ;;  %v2799_v53 = vadd.f32 %v3828_v9, %v5341_v2  ;;  %v2790_v41 = vpop.f32.mrb[161].mxu0 }
 0x461   : > { %2930 = vst [vmem:[%s5353_s15 + $0x68] sm:$0xff] %v2898_v26  ;;  %v2791_v25 = vadd.f32 %v5341_v2, %v2790_v41  ;;  %v3829_v5 = vpop.f32.mrb[162].mxu0  ;;  %v4058_v41 = vld [vmem:[%s4512_s20 + $0xf0] sm:$0xff] }
 0x462   : > { %v2871_v32 = vadd.f32 %v4046_v10, %v2799_v53  ;;  %v2802_v23 = vadd.f32 %v3829_v5, %v5341_v2  ;;  %v2793_v39 = vpop.f32.mrb[163].mxu0 }
 0x463   : > { %v2869_v13 = vadd.f32 %v4047_v44, %v2791_v25  ;;  %v2794_v42 = vadd.f32 %v5341_v2, %v2793_v39 }
 0x464   : > { %v2903_v51 = vmax.f32 %v2871_v32, 0.0  ;;  %v2872_v1 = vadd.f32 %v4048_v60, %v2802_v23  ;;  %v4059_v32 = vld [vmem:[%s4512_s20 + $0xe0] sm:$0xff]  ;;  %v4061_v60 = vld [vmem:[%s4512_s20 + $0xe8] sm:$0xff] }
 0x465   : > { %v2901_v57 = vmax.f32 %v2869_v13, 0.0  ;;  %v2870_v7 = vadd.f32 %v4049_v58, %v2794_v42  ;;  %v4060_v13 = vld [vmem:[%s4512_s20 + $0xf8] sm:$0xff]  ;;  %s4261_s20 = smov [#allocation10]  }
 0x466   : > { %2935 = vst [vmem:[%s5353_s15 + $0x90] sm:$0xff] %v2903_v51  ;;  %v2904_v36 = vmax.f32 %v2872_v1, 0.0  ;;  %s4180_s30 = sshll.u32 %s4261_s20, 4  ;;  %s4181_s30 = int_to_ptr.vmem [resolvable:$false] %s4180_s30 }
 0x467   : > { %2933 = vst [vmem:[%s5353_s15 + $0x80] sm:$0xff] %v2901_v57  ;;  %v2902_v27 = vmax.f32 %v2870_v7, 0.0  ;;  %v3832_v55 = vpop.f32.mrb[164].mxu0  ;;  %s4182_s9 = scalar_lea.vmem %s4181_s30, 8192  ;;  %p4183_p12 = scmp.lt.s32.totalorder %s5447_s12, %s4181_s30 }
 0x468   : > { %2936 = vst [vmem:[%s5353_s15 + $0x98] sm:$0xff] %v2904_v36  ;;  %v2815_v21 = vadd.f32 %v3832_v55, %v5341_v2  ;;  %v2806_v61 = vpop.f32.mrb[165].mxu0  ;;  %p4184_p1 = scmp.lt.s32.totalorder %s4182_s9, %s4176_s13 }
 0x469   : > { %2934 = vst [vmem:[%s5353_s15 + $0x88] sm:$0xff] %v2902_v27  ;;  %v2807_v50 = vadd.f32 %v5341_v2, %v2806_v61  ;;  %v3833_v46 = vpop.f32.mrb[166].mxu0 }
 0x46a   : > { %v2875_v0 = vadd.f32 %v4050_v14, %v2815_v21  ;;  %v2818_v30 = vadd.f32 %v3833_v46, %v5341_v2  ;;  %v2809_v54 = vpop.f32.mrb[167].mxu0  ;;  %p4185_p2 = por %p4184_p1, %p4183_p12 }
 0x46b   : > { %v2873_v17 = vadd.f32 %v4051_v12, %v2807_v50  ;;  %v2810_v29 = vadd.f32 %v5341_v2, %v2809_v54 }
 0x46c   : > { %v2907_v47 = vmax.f32 %v2875_v0, 0.0  ;;  %v2876_v3 = vadd.f32 %v4052_v28, %v2818_v30  ;;  %p4186_p4 = pnand %p4185_p2, %p4179_p7 }
 0x46d   : > { %v2905_v4 = vmax.f32 %v2873_v17, 0.0  ;;  %v2874_v18 = vadd.f32 %v4053_v38, %v2810_v29 }
 0x46e   : > { %2939 = vst [vmem:[%s5353_s15 + $0xb0] sm:$0xff] %v2907_v47  ;;  %v2908_v11 = vmax.f32 %v2876_v3, 0.0 }
 0x46f   : > { %2937 = vst [vmem:[%s5353_s15 + $0xa0] sm:$0xff] %v2905_v4  ;;  %v2906_v45 = vmax.f32 %v2874_v18, 0.0  ;;  %v3836_v56 = vpop.f32.mrb[168].mxu0 }
 0x470   : > { %2940 = vst [vmem:[%s5353_s15 + $0xb8] sm:$0xff] %v2908_v11  ;;  %v2831_v49 = vadd.f32 %v3836_v56, %v5341_v2  ;;  %v2822_v6 = vpop.f32.mrb[169].mxu0 }
 0x471   : > { %2938 = vst [vmem:[%s5353_s15 + $0xa8] sm:$0xff] %v2906_v45  ;;  %v2823_v22 = vadd.f32 %v5341_v2, %v2822_v6  ;;  %v3837_v62 = vpop.f32.mrb[170].mxu0 }
 0x472   : > { %v2879_v48 = vadd.f32 %v4054_v37, %v2831_v49  ;;  %v2834_v35 = vadd.f32 %v3837_v62, %v5341_v2  ;;  %v2825_v31 = vpop.f32.mrb[171].mxu0 }
 0x473   : > { %v2877_v63 = vadd.f32 %v4055_v59, %v2823_v22  ;;  %v2826_v8 = vadd.f32 %v5341_v2, %v2825_v31 }
 0x474   : > { %v2911_v24 = vmax.f32 %v2879_v48, 0.0  ;;  %v2880_v34 = vadd.f32 %v4056_v15, %v2834_v35 }
 0x475   : > { %v2909_v43 = vmax.f32 %v2877_v63, 0.0  ;;  %v2878_v40 = vadd.f32 %v4057_v19, %v2826_v8 }
 0x476   : > { %2943 = vst [vmem:[%s5353_s15 + $0xd0] sm:$0xff] %v2911_v24  ;;  %v2912_v33 = vmax.f32 %v2880_v34, 0.0 }
 0x477   : > { %2941 = vst [vmem:[%s5353_s15 + $0xc0] sm:$0xff] %v2909_v43  ;;  %v2910_v52 = vmax.f32 %v2878_v40, 0.0  ;;  %v3840_v16 = vpop.f32.mrb[172].mxu0 }
 0x478   : > { %2944 = vst [vmem:[%s5353_s15 + $0xd8] sm:$0xff] %v2912_v33  ;;  %v2847_v20 = vadd.f32 %v3840_v16, %v5341_v2  ;;  %v2838_v26 = vpop.f32.mrb[173].mxu0 }
 0x479   : > { %2942 = vst [vmem:[%s5353_s15 + $0xc8] sm:$0xff] %v2910_v52  ;;  %v2839_v9 = vadd.f32 %v5341_v2, %v2838_v26  ;;  %v3841_v53 = vpop.f32.mrb[174].mxu0 }
 0x47a   : > { %v2883_v25 = vadd.f32 %v4058_v41, %v2847_v20  ;;  %v2850_v5 = vadd.f32 %v3841_v53, %v5341_v2  ;;  %v2841_v10 = vpop.f32.mrb[175].mxu0 }
 0x47b   : > { %v2881_v23 = vadd.f32 %v4059_v32, %v2839_v9  ;;  %v2842_v39 = vadd.f32 %v5341_v2, %v2841_v10 }
 0x47c   : > { %v2915_v44 = vmax.f32 %v2883_v25, 0.0  ;;  %v2884_v42 = vadd.f32 %v4060_v13, %v2850_v5 }
 0x47d   : > { %v2913_v51 = vmax.f32 %v2881_v23, 0.0  ;;  %v2882_v1 = vadd.f32 %v4061_v60, %v2842_v39 }
 0x47e   : > { %2947 = vst [vmem:[%s5353_s15 + $0xf0] sm:$0xff] %v2915_v44  ;;  %v2916_v57 = vmax.f32 %v2884_v42, 0.0 }
 0x47f   : > { %2945 = vst [vmem:[%s5353_s15 + $0xe0] sm:$0xff] %v2913_v51  ;;  %v2914_v2 = vmax.f32 %v2882_v1, 0.0 }
 0x480   : > { %2948 = vst [vmem:[%s5353_s15 + $0xf8] sm:$0xff] %v2916_v57 }
 0x481   : > { %2946 = vst [vmem:[%s5353_s15 + $0xe8] sm:$0xff] %v2914_v2 }
 0x482   : > { %4189 = shalt.err (!%p4186_p4)
}
 0x483   : > { %s4190_s23 = scalar_lea.hbm %s5445_s16, 4096  ;;  %s4194_s14 = scalar_lea.hbm %s5501_s7, 8192 }
 0x484   : > { %p4191_p9 = scmp.ne.s32.totalorder %s5445_s16, %s4190_s23  ;;  %p4195_p8 = scmp.lt.u32.totalorder %s5445_s16, %s5501_s7 }
 0x485   : > { %p4196_p13 = scmp.lt.u32.totalorder %s4194_s14, %s4190_s23  ;;  %p4198_p10 = scmp.lt.u32.totalorder %s4190_s23, %s5445_s16 }
 0x486   : > { %p4192_p0 = pnand %p4191_p9, %p4458_p5 }
 0x487   : > { %p4197_p6 = por %p4196_p13, %p4195_p8 }
 0x488   : > { %p4193_p11 = pneg %p4192_p0 }
 0x489   : > { %p4199_p3 = por %p4198_p10, %p4197_p6 }
 0x48b   : > { %p4200_p7 = pnand %p4199_p3, %p4193_p11 }
 0x48d   : > { %4203 = shalt.err (!%p4200_p7)
}
 0x48e   : > { %s4262_s8 = smov 128   ;;  %s4263_s17 = smov 8  }
 0x48f   : > { %3872 = dma.vmem_to_hbm [thread:$0]  (%p4458_p5), %s5447_s12, 4096, %s5445_s16, %s2950_s28, %s4262_s8, %s4262_s8, %s4263_s17  }
 0x490 PF: > { %s5526_s13 = sld [smem:[#allocation15_spill]]  ;;  %s2978_s20 = sand.u32 1, %s4238_s24  }
 0x491   : > { %p5528_p1 = scmp.ge.s32.totalorder %s4250_s27, 2  ;;  %s2979_s30 = scalar_lea.sflag [#allocation4], %s2978_s20 }
 0x496   : > { %p5527_p12 = scmp.ne.s32.totalorder %s5526_s13, 0 }
 0x498   : > { %p3889_p2 = pnand %p5528_p1, %p5527_p12 }
 0x49a   : > { %4233 = dma.done.wait (!%p3889_p2), %s2979_s30, 4096  }
 0x49b   : > { %4235 = vsyncadd (!%p3889_p2), %s2979_s30, 4294963200  ;;  %p22_p4 = scmp.ge.s32.totalorder %s4444_s22, 4   ;;  %s5529_s24 = smov %s4242_s25 }
 0x49c   : > { %s5530_s25 = smov %s4246_s26  ;;  %s5531_s26 = smov %s4454_s18 }
 0x49d   : > { %s5532_s27 = smov %s4444_s22  ;;  %24 = sbr.rel (!%p22_p4) target bundleno = 7 (0x7), region = 105 }
 0x4a4   :  { %2984 = vsyncpa [#allocation3], 1 }
 0x4a5   :  { %2986 = vsyncpa [#allocation3 + $0x1], 1 }
 0x4a6   :  { %2987 = vsyncpa [#allocation6], 1 }
 0x4a7   :  { %2988 = vsyncpa [#allocation9], 1 }
 0x4a8   :  { %2989 = vsyncpa [#allocation4], 1 }
 0x4a9   :  { %2991 = vsyncpa [#allocation4 + $0x1], 1 }

</bundles_post_ra>
